<compile_context>
chip_gen: v7x
topology: tpu7x:2x2x1
jax: 0.10.0
libtpu: 0.0.40
codegen_flags: <defaults>
</compile_context>

<pallas_src>
import math

import jax
import jax.numpy as jnp
from jax.experimental import pallas as pl
from jax.experimental.pallas import tpu as pltpu


def _gc_body(xT_ref, adjT_ref, wT_ref, b_ref, res_ref, out_ref, acc_ref):
    """One (j, k) grid step of a GraphConvolution layer in transposed layout.

      acc[:, j_tile] += (W^T @ X^T[:, k_tile]) @ adj^T[k_tile, j_tile]
    and on the last k step:
      out[:, j_tile] = relu(acc + b (+ residual))
    """
    k = pl.program_id(1)

    @pl.when(k == 0)
    def _():
        acc_ref[...] = jnp.zeros_like(acc_ref)

    # support tile: s^T = W^T @ X^T[:, k_tile]  -> (C_out, tk), bf16 MXU, f32 acc
    s = jnp.dot(wT_ref[...], xT_ref[...], preferred_element_type=jnp.float32)
    # propagate: accumulate s^T @ adj^T[k_tile, j_tile]  -> (C_out, tn)
    acc_ref[...] += jnp.dot(s.astype(jnp.bfloat16), adjT_ref[...],
                            preferred_element_type=jnp.float32)

    @pl.when(k == pl.num_programs(1) - 1)
    def _():
        r = acc_ref[...] + b_ref[...]            # bias add in f32
        if res_ref is not None:
            r = r + res_ref[...]                 # residual in f32
        out_ref[...] = jnp.maximum(r, 0.0).astype(out_ref.dtype)


def _make_gc_kernel(with_residual):
    if with_residual:
        def kernel(xT_ref, adjT_ref, wT_ref, b_ref, res_ref, out_ref, acc_ref):
            _gc_body(xT_ref, adjT_ref, wT_ref, b_ref, res_ref, out_ref, acc_ref)
    else:
        def kernel(xT_ref, adjT_ref, wT_ref, b_ref, out_ref, acc_ref):
            _gc_body(xT_ref, adjT_ref, wT_ref, b_ref, None, out_ref, acc_ref)
    return kernel


def _pick_tile(M):
    # Largest node tile that divides M.  256 already sits near the HBM
    # roofline and keeps the multi-step (accumulator) path exercised even at
    # demo sizes; bump to 512 for production-scale M if profiling warrants.
    for t in (256, 128):
        if M % t == 0:
            return t
    return M  # small / odd M: single full-extent block (still legal).


def _gc_layer(xT_bf16, adjT_bf16, wT_bf16, b_col, residual_f32, out_dtype, tn, tk):
    """One GraphConvolution: out^T = relu((W^T @ X^T) @ adj^T + b [+ res])."""
    c_in, M = xT_bf16.shape
    c_out = wT_bf16.shape[0]
    num_j, num_k = M // tn, M // tk

    in_specs = [
        pl.BlockSpec((c_in, tk), lambda j, k: (0, k)),      # X^T       (bf16)
        pl.BlockSpec((tk, tn), lambda j, k: (k, j)),        # adj^T     (bf16)
        pl.BlockSpec((c_out, c_in), lambda j, k: (0, 0)),   # W^T       (bf16)
        pl.BlockSpec((c_out, 1), lambda j, k: (0, 0)),      # bias      (f32)
    ]
    args = [xT_bf16, adjT_bf16, wT_bf16, b_col]
    if residual_f32 is not None:
        in_specs.append(pl.BlockSpec((c_out, tn), lambda j, k: (0, j)))
        args.append(residual_f32)

    return pl.pallas_call(
        _make_gc_kernel(residual_f32 is not None),
        out_shape=jax.ShapeDtypeStruct((c_out, M), out_dtype),
        grid_spec=pltpu.PrefetchScalarGridSpec(
            num_scalar_prefetch=0,
            grid=(num_j, num_k),
            in_specs=in_specs,
            out_specs=pl.BlockSpec((c_out, tn), lambda j, k: (0, j)),
            scratch_shapes=[pltpu.VMEM((c_out, tn), jnp.float32)],
        ),
        compiler_params=pltpu.CompilerParams(
            dimension_semantics=("parallel", "arbitrary")),
    )(*args)


@jax.jit
def gcn_forward(x_nchw, adj, w1, b1, w2, b2):
    """x_nchw: (N, C, H, W) f32; adj: (M, M) f32, M = N*H*W; nfeat == nhid == C."""
    N, C, H, W = x_nchw.shape
    M = N * H * W
    tn = tk = _pick_tile(M)

    # NCHW -> X^T of shape (C, M); column order (N, H, W) matches the PyTorch
    # permute/view.  adj^T / W^T / bf16 casts are one-time glue outside the kernels.
    xT = jnp.transpose(x_nchw, (1, 0, 2, 3)).reshape(C, M)
    xT_bf16 = xT.astype(jnp.bfloat16)
    adjT_bf16 = adj.T.astype(jnp.bfloat16)
    w1T = w1.T.astype(jnp.bfloat16)
    w2T = w2.T.astype(jnp.bfloat16)
    b1c = b1.reshape(C, 1).astype(jnp.float32)
    b2c = b2.reshape(C, 1).astype(jnp.float32)

    # Layer 1: h1^T = relu(adj @ (X @ W1) + b1)^T, stored bf16 (next MXU operand).
    h1T = _gc_layer(xT_bf16, adjT_bf16, w1T, b1c, None, jnp.bfloat16, tn, tk)
    # Layer 2: out^T = relu(adj @ (h1 @ W2) + b2 + X)^T, residual kept in f32.
    outT = _gc_layer(h1T, adjT_bf16, w2T, b2c, xT, jnp.float32, tn, tk)

    # (C, M) -> (C, N, H, W) -> NCHW
    return jnp.transpose(outT.reshape(C, N, H, W), (1, 0, 2, 3))


def init_gc_params(key, in_features, out_features):
    """Deterministic re-implementation of GraphConvolution.reset_parameters."""
    stdv = 1.0 / math.sqrt(out_features)
    kw, kb = jax.random.split(key)
    w = jax.random.uniform(kw, (in_features, out_features), jnp.float32,
                           minval=-stdv, maxval=stdv)
    b = jax.random.uniform(kb, (out_features,), jnp.float32,
                           minval=-stdv, maxval=stdv)
    return w, b


def gcn_reference(x_nchw, adj, w1, b1, w2, b2):
    """Pure-JAX f32 reference mirroring the PyTorch forward."""
    N, C, H, W = x_nchw.shape
    xf = jnp.transpose(x_nchw, (0, 2, 3, 1)).reshape(-1, C)
    h1 = jnp.maximum(adj @ (xf @ w1) + b1, 0.0)
    h2 = adj @ (h1 @ w2) + b2
    out = jnp.maximum(h2 + xf, 0.0)
    return jnp.transpose(out.reshape(N, H, W, C), (0, 3, 1, 2))


if __name__ == "__main__":
    # nfeat = nhid = 32 (module requires nfeat == nhid), batch 2, 16x16 -> M = 512.
    N, C, H, W = 2, 32, 16, 16
    M = N * H * W

    key = jax.random.PRNGKey(0)
    kx, kadj, k1, k2 = jax.random.split(key, 4)

    x = jax.random.normal(kx, (N, C, H, W), jnp.float32)
    # Row-normalized dense random adjacency (adj.float() implies a dense matmul).
    adj_raw = jax.random.uniform(kadj, (M, M), jnp.float32)
    adj = adj_raw / jnp.sum(adj_raw, axis=1, keepdims=True)

    w1, b1 = init_gc_params(k1, C, C)   # gc1: nfeat -> nhid (== C)
    w2, b2 = init_gc_params(k2, C, C)   # gc2: nhid  -> nhid

    out = jax.block_until_ready(gcn_forward(x, adj, w1, b1, w2, b2))

    ref = gcn_reference(x, adj, w1, b1, w2, b2)
    assert out.shape == (N, C, H, W)
    # bf16 MXU operands with f32 accumulation -> relaxed tolerance vs f32 reference.
    assert jnp.allclose(out, ref, atol=5e-2, rtol=5e-2), float(
        jnp.max(jnp.abs(out - ref)))

    print("KERNEL_OK")
</pallas_src>

<mosaic_0001>
module attributes {stable_mosaic.version = 11 : i64} {
  func.func @kernel(%arg0: i32, %arg1: i32, %arg2: memref<32x256xbf16, #tpu.memory_space<vmem>>, %arg3: memref<256x256xbf16, #tpu.memory_space<vmem>>, %arg4: memref<32x32xbf16, #tpu.memory_space<vmem>>, %arg5: memref<32x1xf32, #tpu.memory_space<vmem>>, %arg6: memref<32x256xbf16, #tpu.memory_space<vmem>>, %arg7: memref<32x256xf32, #tpu.memory_space<vmem>>) attributes {dimension_semantics = [#tpu.dimension_semantics<parallel>, #tpu.dimension_semantics<arbitrary>], iteration_bounds = array<i64: 2, 2>, scalar_prefetch = 0 : i64, scratch_operands = 1 : i64, tpu.core_type = #tpu.core_type<tc>, window_params = [{transform_indices = @transform_0, window_bounds = array<i64: 32, 256>}, {transform_indices = @transform_1, window_bounds = array<i64: 256, 256>}, {pipeline_mode = #tpu.pipeline_mode<synchronous>, transform_indices = @transform_2, window_bounds = array<i64: 32, 32>}, {pipeline_mode = #tpu.pipeline_mode<synchronous>, transform_indices = @transform_3, window_bounds = array<i64: 32, 1>}, {transform_indices = @transform_4, window_bounds = array<i64: 32, 256>}]} {
    %c0_i32 = arith.constant 0 : i32
    %0 = arith.cmpi eq, %arg1, %c0_i32 : i32
    %1 = arith.extui %0 : i1 to i32
    %c0_i32_0 = arith.constant 0 : i32
    %2 = arith.cmpi ne, %1, %c0_i32_0 : i32
    scf.if %2 {
      %cst_12 = arith.constant 0.000000e+00 : f32
      %15 = vector.broadcast %cst_12 : f32 to vector<32x256xf32>
      %c0_13 = arith.constant 0 : index
      %c0_14 = arith.constant 0 : index
      %16 = vector.load %arg7[%c0_13, %c0_14] : memref<32x256xf32, #tpu.memory_space<vmem>>, vector<32x256xf32>
      tpu.vector_store %arg7[%c0_13, %c0_14], %15 {strides = array<i32>} : memref<32x256xf32, #tpu.memory_space<vmem>>, vector<32x256xf32>,
    } else {
    }
    %c0 = arith.constant 0 : index
    %c0_1 = arith.constant 0 : index
    %3 = vector.load %arg4[%c0, %c0_1] : memref<32x32xbf16, #tpu.memory_space<vmem>>, vector<32x32xbf16>
    %c0_2 = arith.constant 0 : index
    %c0_3 = arith.constant 0 : index
    %4 = vector.load %arg2[%c0_2, %c0_3] : memref<32x256xbf16, #tpu.memory_space<vmem>>, vector<32x256xbf16>
    %cst = arith.constant dense<0.000000e+00> : vector<32x256xf32>
    %5 = tpu.matmul %3, %4, %cst {dimension_numbers = #tpu.dot_dimension_numbers<[1], [0], [0], [1], [0, 0, 1, 1], [], []>} : vector<32x32xbf16>, vector<32x256xbf16>, vector<32x256xf32> -> vector<32x256xf32>
    %c0_4 = arith.constant 0 : index
    %c0_5 = arith.constant 0 : index
    %6 = vector.load %arg7[%c0_4, %c0_5] : memref<32x256xf32, #tpu.memory_space<vmem>>, vector<32x256xf32>
    %7 = arith.truncf %5 : vector<32x256xf32> to vector<32x256xbf16>
    %c0_6 = arith.constant 0 : index
    %c0_7 = arith.constant 0 : index
    %8 = vector.load %arg3[%c0_6, %c0_7] : memref<256x256xbf16, #tpu.memory_space<vmem>>, vector<256x256xbf16>
    %cst_8 = arith.constant dense<0.000000e+00> : vector<32x256xf32>
    %9 = tpu.matmul %7, %8, %cst_8 {dimension_numbers = #tpu.dot_dimension_numbers<[1], [0], [0], [1], [0, 0, 1, 1], [], []>} : vector<32x256xbf16>, vector<256x256xbf16>, vector<32x256xf32> -> vector<32x256xf32>
    %10 = arith.addf %6, %9 : vector<32x256xf32>
    %c0_9 = arith.constant 0 : index
    %c0_10 = arith.constant 0 : index
    %11 = vector.load %arg7[%c0_9, %c0_10] : memref<32x256xf32, #tpu.memory_space<vmem>>, vector<32x256xf32>
    tpu.vector_store %arg7[%c0_9, %c0_10], %10 {strides = array<i32>} : memref<32x256xf32, #tpu.memory_space<vmem>>, vector<32x256xf32>,
    %c1_i32 = arith.constant 1 : i32
    %12 = arith.cmpi eq, %arg1, %c1_i32 : i32
    %13 = arith.extui %12 : i1 to i32
    %c0_i32_11 = arith.constant 0 : i32
    %14 = arith.cmpi ne, %13, %c0_i32_11 : i32
    scf.if %14 {
      %c0_12 = arith.constant 0 : index
      %c0_13 = arith.constant 0 : index
      %15 = vector.load %arg7[%c0_12, %c0_13] : memref<32x256xf32, #tpu.memory_space<vmem>>, vector<32x256xf32>
      %c0_14 = arith.constant 0 : index
      %c0_15 = arith.constant 0 : index
      %16 = vector.load %arg5[%c0_14, %c0_15] : memref<32x1xf32, #tpu.memory_space<vmem>>, vector<32x1xf32>
      %17 = vector.broadcast %16 : vector<32x1xf32> to vector<32x256xf32>
      %18 = arith.addf %15, %17 : vector<32x256xf32>
      %cst_16 = arith.constant 0.000000e+00 : f32
      %19 = vector.broadcast %cst_16 : f32 to vector<32x256xf32>
      %20 = arith.maximumf %18, %19 : vector<32x256xf32>
      %21 = arith.truncf %20 : vector<32x256xf32> to vector<32x256xbf16>
      %c0_17 = arith.constant 0 : index
      %c0_18 = arith.constant 0 : index
      %22 = vector.load %arg6[%c0_17, %c0_18] : memref<32x256xbf16, #tpu.memory_space<vmem>>, vector<32x256xbf16>
      tpu.vector_store %arg6[%c0_17, %c0_18], %21 {strides = array<i32>} : memref<32x256xbf16, #tpu.memory_space<vmem>>, vector<32x256xbf16>,
    } else {
    }
    return
  }
  func.func @transform_0(%arg0: i32, %arg1: i32) -> (i32, i32) {
    %c0_i32 = arith.constant 0 : i32
    %c0_i32_0 = arith.constant 0 : i32
    return %c0_i32, %arg1 : i32, i32
  }
  func.func @transform_1(%arg0: i32, %arg1: i32) -> (i32, i32) {
    %c0_i32 = arith.constant 0 : i32
    return %arg1, %arg0 : i32, i32
  }
  func.func @transform_2(%arg0: i32, %arg1: i32) -> (i32, i32) {
    %c0_i32 = arith.constant 0 : i32
    %c0_i32_0 = arith.constant 0 : i32
    %c0_i32_1 = arith.constant 0 : i32
    return %c0_i32, %c0_i32_0 : i32, i32
  }
  func.func @transform_3(%arg0: i32, %arg1: i32) -> (i32, i32) {
    %c0_i32 = arith.constant 0 : i32
    %c0_i32_0 = arith.constant 0 : i32
    %c0_i32_1 = arith.constant 0 : i32
    return %c0_i32, %c0_i32_0 : i32, i32
  }
  func.func @transform_4(%arg0: i32, %arg1: i32) -> (i32, i32) {
    %c0_i32 = arith.constant 0 : i32
    %c0_i32_0 = arith.constant 0 : i32
    return %c0_i32, %arg0 : i32, i32
  }
}

module attributes {stable_mosaic.version = 11 : i64} {
  func.func @kernel(%arg0: i32, %arg1: i32, %arg2: memref<32x256xbf16, #tpu.memory_space<vmem>>, %arg3: memref<256x256xbf16, #tpu.memory_space<vmem>>, %arg4: memref<32x32xbf16, #tpu.memory_space<vmem>>, %arg5: memref<32x1xf32, #tpu.memory_space<vmem>>, %arg6: memref<32x256xf32, #tpu.memory_space<vmem>>, %arg7: memref<32x256xf32, #tpu.memory_space<vmem>>, %arg8: memref<32x256xf32, #tpu.memory_space<vmem>>) attributes {dimension_semantics = [#tpu.dimension_semantics<parallel>, #tpu.dimension_semantics<arbitrary>], iteration_bounds = array<i64: 2, 2>, scalar_prefetch = 0 : i64, scratch_operands = 1 : i64, tpu.core_type = #tpu.core_type<tc>, window_params = [{transform_indices = @transform_0, window_bounds = array<i64: 32, 256>}, {transform_indices = @transform_1, window_bounds = array<i64: 256, 256>}, {pipeline_mode = #tpu.pipeline_mode<synchronous>, transform_indices = @transform_2, window_bounds = array<i64: 32, 32>}, {pipeline_mode = #tpu.pipeline_mode<synchronous>, transform_indices = @transform_3, window_bounds = array<i64: 32, 1>}, {transform_indices = @transform_4, window_bounds = array<i64: 32, 256>}, {transform_indices = @transform_5, window_bounds = array<i64: 32, 256>}]} {
    %c0_i32 = arith.constant 0 : i32
    %0 = arith.cmpi eq, %arg1, %c0_i32 : i32
    %1 = arith.extui %0 : i1 to i32
    %c0_i32_0 = arith.constant 0 : i32
    %2 = arith.cmpi ne, %1, %c0_i32_0 : i32
    scf.if %2 {
      %cst_12 = arith.constant 0.000000e+00 : f32
      %15 = vector.broadcast %cst_12 : f32 to vector<32x256xf32>
      %c0_13 = arith.constant 0 : index
      %c0_14 = arith.constant 0 : index
      %16 = vector.load %arg8[%c0_13, %c0_14] : memref<32x256xf32, #tpu.memory_space<vmem>>, vector<32x256xf32>
      tpu.vector_store %arg8[%c0_13, %c0_14], %15 {strides = array<i32>} : memref<32x256xf32, #tpu.memory_space<vmem>>, vector<32x256xf32>,
    } else {
    }
    %c0 = arith.constant 0 : index
    %c0_1 = arith.constant 0 : index
    %3 = vector.load %arg4[%c0, %c0_1] : memref<32x32xbf16, #tpu.memory_space<vmem>>, vector<32x32xbf16>
    %c0_2 = arith.constant 0 : index
    %c0_3 = arith.constant 0 : index
    %4 = vector.load %arg2[%c0_2, %c0_3] : memref<32x256xbf16, #tpu.memory_space<vmem>>, vector<32x256xbf16>
    %cst = arith.constant dense<0.000000e+00> : vector<32x256xf32>
    %5 = tpu.matmul %3, %4, %cst {dimension_numbers = #tpu.dot_dimension_numbers<[1], [0], [0], [1], [0, 0, 1, 1], [], []>} : vector<32x32xbf16>, vector<32x256xbf16>, vector<32x256xf32> -> vector<32x256xf32>
    %c0_4 = arith.constant 0 : index
    %c0_5 = arith.constant 0 : index
    %6 = vector.load %arg8[%c0_4, %c0_5] : memref<32x256xf32, #tpu.memory_space<vmem>>, vector<32x256xf32>
    %7 = arith.truncf %5 : vector<32x256xf32> to vector<32x256xbf16>
    %c0_6 = arith.constant 0 : index
    %c0_7 = arith.constant 0 : index
    %8 = vector.load %arg3[%c0_6, %c0_7] : memref<256x256xbf16, #tpu.memory_space<vmem>>, vector<256x256xbf16>
    %cst_8 = arith.constant dense<0.000000e+00> : vector<32x256xf32>
    %9 = tpu.matmul %7, %8, %cst_8 {dimension_numbers = #tpu.dot_dimension_numbers<[1], [0], [0], [1], [0, 0, 1, 1], [], []>} : vector<32x256xbf16>, vector<256x256xbf16>, vector<32x256xf32> -> vector<32x256xf32>
    %10 = arith.addf %6, %9 : vector<32x256xf32>
    %c0_9 = arith.constant 0 : index
    %c0_10 = arith.constant 0 : index
    %11 = vector.load %arg8[%c0_9, %c0_10] : memref<32x256xf32, #tpu.memory_space<vmem>>, vector<32x256xf32>
    tpu.vector_store %arg8[%c0_9, %c0_10], %10 {strides = array<i32>} : memref<32x256xf32, #tpu.memory_space<vmem>>, vector<32x256xf32>,
    %c1_i32 = arith.constant 1 : i32
    %12 = arith.cmpi eq, %arg1, %c1_i32 : i32
    %13 = arith.extui %12 : i1 to i32
    %c0_i32_11 = arith.constant 0 : i32
    %14 = arith.cmpi ne, %13, %c0_i32_11 : i32
    scf.if %14 {
      %c0_12 = arith.constant 0 : index
      %c0_13 = arith.constant 0 : index
      %15 = vector.load %arg8[%c0_12, %c0_13] : memref<32x256xf32, #tpu.memory_space<vmem>>, vector<32x256xf32>
      %c0_14 = arith.constant 0 : index
      %c0_15 = arith.constant 0 : index
      %16 = vector.load %arg5[%c0_14, %c0_15] : memref<32x1xf32, #tpu.memory_space<vmem>>, vector<32x1xf32>
      %17 = vector.broadcast %16 : vector<32x1xf32> to vector<32x256xf32>
      %18 = arith.addf %15, %17 : vector<32x256xf32>
      %c0_16 = arith.constant 0 : index
      %c0_17 = arith.constant 0 : index
      %19 = vector.load %arg6[%c0_16, %c0_17] : memref<32x256xf32, #tpu.memory_space<vmem>>, vector<32x256xf32>
      %20 = arith.addf %18, %19 : vector<32x256xf32>
      %cst_18 = arith.constant 0.000000e+00 : f32
      %21 = vector.broadcast %cst_18 : f32 to vector<32x256xf32>
      %22 = arith.maximumf %20, %21 : vector<32x256xf32>
      %c0_19 = arith.constant 0 : index
      %c0_20 = arith.constant 0 : index
      %23 = vector.load %arg7[%c0_19, %c0_20] : memref<32x256xf32, #tpu.memory_space<vmem>>, vector<32x256xf32>
      tpu.vector_store %arg7[%c0_19, %c0_20], %22 {strides = array<i32>} : memref<32x256xf32, #tpu.memory_space<vmem>>, vector<32x256xf32>,
    } else {
    }
    return
  }
  func.func @transform_0(%arg0: i32, %arg1: i32) -> (i32, i32) {
    %c0_i32 = arith.constant 0 : i32
    %c0_i32_0 = arith.constant 0 : i32
    return %c0_i32, %arg1 : i32, i32
  }
  func.func @transform_1(%arg0: i32, %arg1: i32) -> (i32, i32) {
    %c0_i32 = arith.constant 0 : i32
    return %arg1, %arg0 : i32, i32
  }
  func.func @transform_2(%arg0: i32, %arg1: i32) -> (i32, i32) {
    %c0_i32 = arith.constant 0 : i32
    %c0_i32_0 = arith.constant 0 : i32
    %c0_i32_1 = arith.constant 0 : i32
    return %c0_i32, %c0_i32_0 : i32, i32
  }
  func.func @transform_3(%arg0: i32, %arg1: i32) -> (i32, i32) {
    %c0_i32 = arith.constant 0 : i32
    %c0_i32_0 = arith.constant 0 : i32
    %c0_i32_1 = arith.constant 0 : i32
    return %c0_i32, %c0_i32_0 : i32, i32
  }
  func.func @transform_4(%arg0: i32, %arg1: i32) -> (i32, i32) {
    %c0_i32 = arith.constant 0 : i32
    %c0_i32_0 = arith.constant 0 : i32
    return %c0_i32, %arg0 : i32, i32
  }
  func.func @transform_5(%arg0: i32, %arg1: i32) -> (i32, i32) {
    %c0_i32 = arith.constant 0 : i32
    %c0_i32_0 = arith.constant 0 : i32
    return %c0_i32, %arg0 : i32, i32
  }
}

</mosaic_0001>

<bundles_post_ra>
// kernel: gcn_forward.2
= control target key start
LH: loop header
LB: loop body
LE: loop exit
PB: predicated region body
PF: predicated region fallthrough
CT: control target
= control target key end

     0   :  { %s1677_s0 = inlined_call_operand.vmem [shape: bf16[32,512], index: 0, kind: input, shape index: {}]   ;;  %s1678_s1 = inlined_call_operand.vmem [shape: bf16[512,512], index: 1, kind: input, shape index: {}]   ;;  %s1679_s2 = inlined_call_operand.vmem [shape: bf16[32,32], index: 2, kind: input, shape index: {}]   ;;  %s1680_s3 = inlined_call_operand.vmem [shape: f32[32,1], index: 3, kind: input, shape index: {}]   ;;  %s1681_s4 = inlined_call_operand.vmem [shape: bf16[32,512], index: 4, kind: output, shape index: {}]  }
   0x1   :  { %1684 = sst [smem:[#allocation8_spill]] %s1677_s0 }
   0x2   :  { %s1385_s15 = smov 0   ;;  %s1387_s16 = smov 0  }
   0x3   :  { %s1389_s17 = smov 0   ;;  %s1391_s18 = smov 0  }
   0x4   :  { %s1393_s19 = smov 0   ;;  %s1395_s20 = smov 0  }
   0x5   :  { %s1397_s21 = smov 0   ;;  %s1399_s22 = smov 0  }
   0x6   :  { %s1401_s23 = smov 0   ;;  %s1403_s24 = smov 0  }
   0x7   :  { %s1405_s25 = smov 0  }
   0x8 LB: > { %s1046_s26 = sadd.s32 4294967295, %s1355_s25   ;;  %s23_s27 = sadd.s32 1, %s1347_s23  ;;  %s1355_s25 = sphi %s1405_s25, %s14_s25   ;;  %s1351_s24 = sphi %s1403_s24, %s1702_s24   ;;  %s1347_s23 = sphi %s1401_s23, %s1701_s23   ;;  %s1343_s22 = sphi %s1399_s22, %s1700_s22   ;;  %s1339_s21 = sphi %s1397_s21, %s1699_s21   ;;  %s1335_s20 = sphi %s1395_s20, %s1698_s20   ;;  %s1331_s19 = sphi %s1393_s19, %s1697_s19   ;;  %s1327_s18 = sphi %s1391_s18, %s1696_s18   ;;  %s1323_s17 = sphi %s1389_s17, %s1695_s17   ;;  %s1319_s16 = sphi %s1387_s16, %s1694_s16   ;;  %s1315_s15 = sphi %s1385_s15, %s1693_s15  }
   0x9   : > { %p24_p0 = scmp.ge.s32.totalorder %s23_s27, 2  ;;  %s26_s28 = sadd.s32 1, %s1351_s24 }
   0xa   : > { %s33_s29 = sadd.s32 1, %s1335_s20  ;;  %p40_p1 = scmp.ne.s32.totalorder %s1335_s20, %s1331_s19 }
   0xb   : > { %s1704_s27 = smov (%p24_p0, %s23_s27), 0  ;;  %s1706_s28 = smov (!%p24_p0, %s26_s28), %s1351_s24 }
   0xc   : > { %1685 = sst [smem:[#allocation6_spill]] %s1704_s27  ;;  %s30_s30 = ssub.s32 %s1347_s23, %s1704_s27 }
   0xd   : > { %p41_p2 = scmp.eq.s32.totalorder %s1355_s25, 0  ;;  %p28_p3 = scmp.ge.s32.totalorder %s1706_s28, 2 }
   0xe   : > { %p31_p4 = scmp.eq.s32.totalorder %s30_s30, 0  ;;  %s61_s6 = sadd.s32 1, %s1327_s18 }
   0xf   : > { %p1452_p5 = por %p41_p2, %p40_p1  ;;  %s1708_s28 = smov (%p28_p3, %s1706_s28), 0 }
  0x10   : > { %1687 = sst [smem:[#allocation7_spill]] %s1708_s28  ;;  %s57_s8 = ssub.s32 %s1351_s24, %s1708_s28 }
  0x11   : > { %s1460_s7 = scalar_select %p31_p4, %s1335_s20, %s33_s29  }
  0x12   : > { %p68_p6 = scmp.ne.s32.totalorder %s1327_s18, %s1323_s17  ;;  %s58_s9 = sor.u32 %s57_s8, %s30_s30 }
  0x13   : > { %p127_p7 = scmp.eq.s32.totalorder %s57_s8, 0  ;;  %p59_p8 = scmp.eq.s32.totalorder %s58_s9, 0 }
  0x14   : > { %p1466_p9 = por %p68_p6, %p41_p2  ;;  %s129_s11 = sadd.s32 1, %s1319_s16 }
  0x15   : > { %p139_p10 = scmp.ne.s32.totalorder %s1319_s16, %s1315_s15  ;;  %p140_p11 = scmp.eq.s32.totalorder %s1046_s26, 3 }
  0x16   : > { %s1474_s12 = scalar_select %p59_p8, %s1327_s18, %s61_s6  }
  0x17   : > { %s1477_s13 = scalar_select %p127_p7, %s1319_s16, %s129_s11  }
  0x18   : > { %p1479_p12 = por %p140_p11, %p139_p10  ;;  %p1049_p13 = scmp.ge.s32.totalorder %s1355_s25, 4 }
  0x1a   : > { %168 = sbr.rel (%p1049_p13) target bundleno = 68 (0x44), region = 24 }
  0x21   : > { %171 = sbr.rel (!%p1452_p5) target bundleno = 45 (0x2d), region = 28  ;;  %s173_s29 = sand.u32 (%p1452_p5), 1, %s1335_s20  }
  0x22   : > { %s1113_s30 = sshll.u32 (%p1452_p5), %s1347_s23, 3  ;;  %s1050_s8 = sshll.u32 (%p1452_p5), %s173_s29, 5 }
  0x23   : > { %s1690_s0 = sld [smem:[#allocation8_spill]] (%p1452_p5)  ;;  %s175_s26 = scalar_lea.vmem (%p1452_p5), [#allocation3], %s1050_s8 }
  0x29   : > { %s178_s11 = scalar_lea.vmem %s1690_s0, %s1113_s30 }
  0x2a   : > { %v212_v0 = vld [vmem:[%s178_s11] sm:$0xff]  ;;  %v214_v1 = vld [vmem:[%s178_s11 + $0x10] sm:$0xff] }
  0x2b   : > { %v216_v2 = vld [vmem:[%s178_s11 + $0x20] sm:$0xff]  ;;  %213 = vst [vmem:[%s175_s26] sm:$0xff] %v212_v0  ;;  %215 = vst [vmem:[%s175_s26 + $0x8] sm:$0xff] %v214_v1  ;;  %v218_v3 = vld [vmem:[%s178_s11 + $0x30] sm:$0xff] }
  0x2c   : > { %217 = vst [vmem:[%s175_s26 + $0x10] sm:$0xff] %v216_v2  ;;  %219 = vst [vmem:[%s175_s26 + $0x18] sm:$0xff] %v218_v3 }
  0x2d PF: > { %225 = sbr.rel (!%p1466_p9) target bundleno = 68 (0x44), region = 66  ;;  %s227_s5 = sand.u32 (%p1466_p9), 1, %s1327_s18  }
  0x2e   : > { %s1055_s29 = sshll.u32 (%p1466_p9), %s1351_s24, 1  ;;  %s1053_s6 = sshll.u32 (%p1466_p9), %s227_s5, 8 }
  0x2f   : > { %s1114_s30 = sshll.u32 (%p1466_p9), %s1347_s23, 7  ;;  %s1504_s10 = scalar_lea.vmem (%p1466_p9), [#allocation4], %s1053_s6 }
  0x30   : > { %s233_s9 = sadd.s32 (%p1466_p9), %s1114_s30, %s1055_s29 }
  0x31   : > { %s1057_s0 = sshll.u32 (%p1466_p9), %s233_s9, 2 }
  0x32   : > { %s1499_s27 = scalar_lea.vmem (%p1466_p9), %s1678_s1, %s1057_s0 }
  0x33   : > { %v325_v4 = vld [vmem:[%s1499_s27] sm:$0xff] (%p1466_p9)  ;;  %v327_v5 = vld [vmem:[%s1499_s27 + $0x10] sm:$0xff] (%p1466_p9) }
  0x34   : > { %v329_v6 = vld [vmem:[%s1499_s27 + $0x20] sm:$0xff]  ;;  %326 = vst [vmem:[%s1504_s10] sm:$0xff] %v325_v4  ;;  %328 = vst [vmem:[%s1504_s10 + $0x8] sm:$0xff] %v327_v5  ;;  %v331_v7 = vld [vmem:[%s1499_s27 + $0x30] sm:$0xff] }
  0x35   : > { %330 = vst [vmem:[%s1504_s10 + $0x10] sm:$0xff] %v329_v6  ;;  %v333_v8 = vld [vmem:[%s1499_s27 + $0x40] sm:$0xff]  ;;  %v335_v9 = vld [vmem:[%s1499_s27 + $0x50] sm:$0xff]  ;;  %332 = vst [vmem:[%s1504_s10 + $0x18] sm:$0xff] %v331_v7 }
  0x36   : > { %334 = vst [vmem:[%s1504_s10 + $0x20] sm:$0xff] %v333_v8  ;;  %336 = vst [vmem:[%s1504_s10 + $0x28] sm:$0xff] %v335_v9  ;;  %v337_v10 = vld [vmem:[%s1499_s27 + $0x60] sm:$0xff]  ;;  %v339_v11 = vld [vmem:[%s1499_s27 + $0x70] sm:$0xff] }
  0x37   : > { %v341_v12 = vld [vmem:[%s1499_s27 + $0x80] sm:$0xff]  ;;  %338 = vst [vmem:[%s1504_s10 + $0x30] sm:$0xff] %v337_v10  ;;  %340 = vst [vmem:[%s1504_s10 + $0x38] sm:$0xff] %v339_v11  ;;  %v343_v13 = vld [vmem:[%s1499_s27 + $0x90] sm:$0xff] }
  0x38   : > { %342 = vst [vmem:[%s1504_s10 + $0x40] sm:$0xff] %v341_v12  ;;  %v345_v14 = vld [vmem:[%s1499_s27 + $0xa0] sm:$0xff]  ;;  %v347_v15 = vld [vmem:[%s1499_s27 + $0xb0] sm:$0xff]  ;;  %344 = vst [vmem:[%s1504_s10 + $0x48] sm:$0xff] %v343_v13 }
  0x39   : > { %346 = vst [vmem:[%s1504_s10 + $0x50] sm:$0xff] %v345_v14  ;;  %348 = vst [vmem:[%s1504_s10 + $0x58] sm:$0xff] %v347_v15  ;;  %v349_v16 = vld [vmem:[%s1499_s27 + $0xc0] sm:$0xff]  ;;  %v351_v17 = vld [vmem:[%s1499_s27 + $0xd0] sm:$0xff] }
  0x3a   : > { %v353_v18 = vld [vmem:[%s1499_s27 + $0xe0] sm:$0xff]  ;;  %350 = vst [vmem:[%s1504_s10 + $0x60] sm:$0xff] %v349_v16  ;;  %352 = vst [vmem:[%s1504_s10 + $0x68] sm:$0xff] %v351_v17  ;;  %v355_v19 = vld [vmem:[%s1499_s27 + $0xf0] sm:$0xff] }
  0x3b   : > { %354 = vst [vmem:[%s1504_s10 + $0x70] sm:$0xff] %v353_v18  ;;  %v357_v20 = vld [vmem:[%s1499_s27 + $0x100] sm:$0xff]  ;;  %v359_v21 = vld [vmem:[%s1499_s27 + $0x110] sm:$0xff]  ;;  %356 = vst [vmem:[%s1504_s10 + $0x78] sm:$0xff] %v355_v19 }
  0x3c   : > { %358 = vst [vmem:[%s1504_s10 + $0x80] sm:$0xff] %v357_v20  ;;  %360 = vst [vmem:[%s1504_s10 + $0x88] sm:$0xff] %v359_v21  ;;  %v361_v22 = vld [vmem:[%s1499_s27 + $0x120] sm:$0xff]  ;;  %v363_v23 = vld [vmem:[%s1499_s27 + $0x130] sm:$0xff] }
  0x3d   : > { %v365_v24 = vld [vmem:[%s1499_s27 + $0x140] sm:$0xff]  ;;  %362 = vst [vmem:[%s1504_s10 + $0x90] sm:$0xff] %v361_v22  ;;  %364 = vst [vmem:[%s1504_s10 + $0x98] sm:$0xff] %v363_v23  ;;  %v367_v25 = vld [vmem:[%s1499_s27 + $0x150] sm:$0xff] }
  0x3e   : > { %366 = vst [vmem:[%s1504_s10 + $0xa0] sm:$0xff] %v365_v24  ;;  %v369_v26 = vld [vmem:[%s1499_s27 + $0x160] sm:$0xff]  ;;  %v371_v27 = vld [vmem:[%s1499_s27 + $0x170] sm:$0xff]  ;;  %368 = vst [vmem:[%s1504_s10 + $0xa8] sm:$0xff] %v367_v25 }
  0x3f   : > { %370 = vst [vmem:[%s1504_s10 + $0xb0] sm:$0xff] %v369_v26  ;;  %372 = vst [vmem:[%s1504_s10 + $0xb8] sm:$0xff] %v371_v27  ;;  %v373_v28 = vld [vmem:[%s1499_s27 + $0x180] sm:$0xff]  ;;  %v375_v29 = vld [vmem:[%s1499_s27 + $0x190] sm:$0xff] }
  0x40   : > { %v377_v30 = vld [vmem:[%s1499_s27 + $0x1a0] sm:$0xff]  ;;  %374 = vst [vmem:[%s1504_s10 + $0xc0] sm:$0xff] %v373_v28  ;;  %376 = vst [vmem:[%s1504_s10 + $0xc8] sm:$0xff] %v375_v29  ;;  %v379_v31 = vld [vmem:[%s1499_s27 + $0x1b0] sm:$0xff] }
  0x41   : > { %378 = vst [vmem:[%s1504_s10 + $0xd0] sm:$0xff] %v377_v30  ;;  %v381_v32 = vld [vmem:[%s1499_s27 + $0x1c0] sm:$0xff]  ;;  %v383_v33 = vld [vmem:[%s1499_s27 + $0x1d0] sm:$0xff]  ;;  %380 = vst [vmem:[%s1504_s10 + $0xd8] sm:$0xff] %v379_v31 }
  0x42   : > { %382 = vst [vmem:[%s1504_s10 + $0xe0] sm:$0xff] %v381_v32  ;;  %384 = vst [vmem:[%s1504_s10 + $0xe8] sm:$0xff] %v383_v33  ;;  %v385_v34 = vld [vmem:[%s1499_s27 + $0x1e0] sm:$0xff]  ;;  %v387_v35 = vld [vmem:[%s1499_s27 + $0x1f0] sm:$0xff] }
  0x43   : > { %386 = vst [vmem:[%s1504_s10 + $0xf0] sm:$0xff] %v385_v34  ;;  %388 = vst [vmem:[%s1504_s10 + $0xf8] sm:$0xff] %v387_v35 }
  0x44 PF: > { %p1058_p0 = scmp.ge.s32.totalorder %s1355_s25, 1  ;;  %p393_p1 = scmp.lt.s32.totalorder %s1355_s25, 5 }
  0x46   : > { %p394_p2 = pnand %p1058_p0, %p393_p1 }
  0x47   : > { %s400_s0 = sand.u32 (!%p394_p2), 1, %s1331_s19   ;;  %s407_s28 = sand.u32 (!%p394_p2), 1, %s1323_s17  }
  0x48   : > { %397 = sbr.rel (%p394_p2) target bundleno = 561 (0x231), region = 104  ;;  %s1059_s11 = sshll.u32 (!%p394_p2), %s400_s0, 5 }
  0x49   : > { %s1060_s26 = sshll.u32 (!%p394_p2), %s407_s28, 8  ;;  %s432_s5 = sand.u32 (!%p394_p2), 1, %s1315_s15  }
  0x4a   : > { %s1061_s29 = sshll.u32 (!%p394_p2), %s432_s5, 5  ;;  %s402_s27 = scalar_lea.vmem (!%p394_p2), [#allocation3], %s1059_s11 }
  0x4b   : > { %s1572_s6 = scalar_lea.vmem (!%p394_p2), [#allocation4], %s1060_s26  ;;  %s1574_s30 = scalar_lea.vmem (!%p394_p2), [#allocation5], %s1061_s29 }
  0x4c   : > { %p1062_p3 = scmp.ne.s32.totalorder (!%p394_p2), %s1339_s21, 0 }
  0x4f   : > { %443 = sbr.rel (%p1062_p3) target bundleno = 86 (0x56), region = 116  ;;  %v1357_v36 = vmov (!%p1062_p3), 0.0  }
  0x50   : > { %444 = vst [vmem:[#allocation2] sm:$0xff] (!%p1062_p3), %v1357_v36  ;;  %445 = vst [vmem:[#allocation2 + $0x8] sm:$0xff] (!%p1062_p3), %v1357_v36 }
  0x51   : > { %446 = vst [vmem:[#allocation2 + $0x10] sm:$0xff] (!%p1062_p3), %v1357_v36  ;;  %447 = vst [vmem:[#allocation2 + $0x18] sm:$0xff] (!%p1062_p3), %v1357_v36 }
  0x52   : > { %448 = vst [vmem:[#allocation2 + $0x20] sm:$0xff] (!%p1062_p3), %v1357_v36  ;;  %449 = vst [vmem:[#allocation2 + $0x28] sm:$0xff] (!%p1062_p3), %v1357_v36 }
  0x53   : > { %450 = vst [vmem:[#allocation2 + $0x30] sm:$0xff] (!%p1062_p3), %v1357_v36  ;;  %451 = vst [vmem:[#allocation2 + $0x38] sm:$0xff] (!%p1062_p3), %v1357_v36 }
  0x56 PF: > { %v1211_v37 = vld [vmem:[%s402_s27 + $0x4] ss:$8 sps:$4 sm:$0xff]   ;;  %v1213_v38 = vld [vmem:[%s402_s27] ss:$8 sps:$4 sm:$0xff]   ;;  %v1358_v39 = vmov 0   ;;  %vm490_vm0 = vcmask 261120  }
  0x57   : > { %529 = vmatprep.mubr.bf16.mxu0 %v1358_v39  ;;  %497 = vmatprep.subr.bf16.mxu0 %v1211_v37  ;;  %v1214_v40 = vld [vmem:[%s402_s27 + $0x14] ss:$8 sps:$4 sm:$0xff]   ;;  %v1216_v41 = vld [vmem:[%s402_s27 + $0x10] ss:$8 sps:$4 sm:$0xff]   ;;  %v1217_v42 = vld [vmem:[%s1679_s2] sm:$0xff]   ;;  %p1103_p4 = scmp.ne.s32.totalorder %s1339_s21, 1 }
  0x58   : > { %498 = vmatpush1.bf16.msra.mxu0 %v1213_v38  ;;  %v1219_v43 = vld [vmem:[%s1572_s6 + $0x4] ss:$8 sps:$4 sm:$0xff]   ;;  %v1221_v44 = vld [vmem:[%s1572_s6] ss:$8 sps:$4 sm:$0xff]   ;;  %v1222_v45 = vld [vmem:[%s1572_s6 + $0x14] ss:$8 sps:$4 sm:$0xff]  }
  0x59   : > { %499 = vmatprep.subr.bf16.mxu0 %v1214_v40  ;;  %754 = vmatprep.subr.bf16.mxu1 %v1219_v43  ;;  %v1224_v46 = vld [vmem:[%s1572_s6 + $0x10] ss:$8 sps:$4 sm:$0xff]   ;;  %v1225_v47 = vld [vmem:[%s1572_s6 + $0x24] ss:$8 sps:$4 sm:$0xff]   ;;  %v1227_v48 = vld [vmem:[%s1572_s6 + $0x20] ss:$8 sps:$4 sm:$0xff]  }
  0x5a   : > { %755 = vmatpush1.bf16.msra.mxu1 %v1221_v44  ;;  %v1228_v49 = vld [vmem:[%s1572_s6 + $0x34] ss:$8 sps:$4 sm:$0xff]   ;;  %v1218_v50 = vld [vmem:[%s1679_s2 + $0x8] sm:$0xff]   ;;  %v1230_v51 = vld [vmem:[%s1572_s6 + $0x30] ss:$8 sps:$4 sm:$0xff]  }
  0x5b   : > { %756 = vmatprep.subr.bf16.mxu1 %v1222_v45  ;;  %v1231_v52 = vld [vmem:[%s1572_s6 + $0x44] ss:$8 sps:$4 sm:$0xff]   ;;  %v1233_v53 = vld [vmem:[%s1572_s6 + $0x40] ss:$8 sps:$4 sm:$0xff]   ;;  %v1234_v54 = vld [vmem:[%s1572_s6 + $0x54] ss:$8 sps:$4 sm:$0xff]  }
  0x5c   : > { %500 = vmatpush1.bf16.msra.mxu0 %v1216_v41  ;;  %v1236_v55 = vld [vmem:[%s1572_s6 + $0x50] ss:$8 sps:$4 sm:$0xff]   ;;  %v1237_v56 = vld [vmem:[%s1572_s6 + $0x64] ss:$8 sps:$4 sm:$0xff]   ;;  %v1239_v57 = vld [vmem:[%s1572_s6 + $0x60] ss:$8 sps:$4 sm:$0xff]  }
  0x5d   : > { %v1240_v58 = vld [vmem:[%s1572_s6 + $0x74] ss:$8 sps:$4 sm:$0xff]   ;;  %v1242_v59 = vld [vmem:[%s1572_s6 + $0x70] ss:$8 sps:$4 sm:$0xff]   ;;  %v1243_v60 = vld [vmem:[%s1572_s6 + $0x84] ss:$8 sps:$4 sm:$0xff]  }
  0x5e   : > { %757 = vmatpush1.bf16.msra.mxu1 %v1224_v46  ;;  %v1245_v61 = vld [vmem:[%s1572_s6 + $0x80] ss:$8 sps:$4 sm:$0xff]   ;;  %v1246_v62 = vld [vmem:[%s1572_s6 + $0x94] ss:$8 sps:$4 sm:$0xff]   ;;  %v1248_v63 = vld [vmem:[%s1572_s6 + $0x90] ss:$8 sps:$4 sm:$0xff]  }
  0x5f   : > { %1069 = vmatmul.mubr.msk.bf16.vlgmr.msra.gmra.mrb[0].mxu0 %vm490_vm0, %v1217_v42  ;;  %758 = vmatprep.subr.bf16.mxu1 %v1225_v47  ;;  %v1249_v0 = vld [vmem:[%s1572_s6 + $0xa4] ss:$8 sps:$4 sm:$0xff]   ;;  %v1251_v1 = vld [vmem:[%s1572_s6 + $0xa0] ss:$8 sps:$4 sm:$0xff]   ;;  %v1252_v2 = vld [vmem:[%s1572_s6 + $0xb4] ss:$8 sps:$4 sm:$0xff]  }
  0x60   : > { %539 = vmatprep.mubr.bf16.mxu0 %v1358_v39  ;;  %v1254_v3 = vld [vmem:[%s1572_s6 + $0xb0] ss:$8 sps:$4 sm:$0xff]   ;;  %v1255_v4 = vld [vmem:[%s1572_s6 + $0xc4] ss:$8 sps:$4 sm:$0xff]   ;;  %v1257_v5 = vld [vmem:[%s1572_s6 + $0xc0] ss:$8 sps:$4 sm:$0xff]  }
  0x61   : > { %v1258_v6 = vld [vmem:[%s1572_s6 + $0xd4] ss:$8 sps:$4 sm:$0xff]   ;;  %v1260_v7 = vld [vmem:[%s1572_s6 + $0xd0] ss:$8 sps:$4 sm:$0xff]   ;;  %v1261_v8 = vld [vmem:[%s1572_s6 + $0xe4] ss:$8 sps:$4 sm:$0xff]  }
  0x62   : > { %759 = vmatpush1.bf16.msra.mxu1 %v1227_v48  ;;  %v1263_v9 = vld [vmem:[%s1572_s6 + $0xe0] ss:$8 sps:$4 sm:$0xff]   ;;  %v1264_v10 = vld [vmem:[%s1572_s6 + $0xf4] ss:$8 sps:$4 sm:$0xff]   ;;  %v1266_v11 = vld [vmem:[%s1572_s6 + $0xf0] ss:$8 sps:$4 sm:$0xff]  }
  0x63   : > { %760 = vmatprep.subr.bf16.mxu1 %v1228_v49  ;;  %v550_v24 = vld [vmem:[#allocation2] sm:$0xff]  ;;  %v551_v25 = vld [vmem:[#allocation2 + $0x8] sm:$0xff]  ;;  %v552_v27 = vld [vmem:[#allocation2 + $0x10] sm:$0xff] }
  0x64   : > { %v553_v30 = vld [vmem:[#allocation2 + $0x18] sm:$0xff]  ;;  %v554_v36 = vld [vmem:[#allocation2 + $0x20] sm:$0xff]  ;;  %v555_v37 = vld [vmem:[#allocation2 + $0x28] sm:$0xff] }
  0x65   : > { %v556_v39 = vld [vmem:[#allocation2 + $0x30] sm:$0xff]  ;;  %v557_v42 = vld [vmem:[#allocation2 + $0x38] sm:$0xff]  ;;  %v835_v49 = vld [vmem:[%s1680_s3] sm:$0xff] (!%p1103_p4) }
  0x66   : > { %761 = vmatpush1.bf16.msra.mxu1 %v1230_v51  ;;  %v837_v48 = vld [vmem:[%s1680_s3 + $0x10] sm:$0xff] (!%p1103_p4)  ;;  %v838_v51 = vld [vmem:[%s1680_s3 + $0x18] sm:$0xff] (!%p1103_p4) }
  0x67   : > { %1070 = vmatmul.mubr.msk.bf16.gmra.mrb[4].mxu0 %vm490_vm0, %v1218_v50  ;;  %762 = vmatprep.subr.bf16.mxu1 %v1231_v52  ;;  %v1359_v50 = vmov (!%p1103_p4), 0   ;;  %v836_v52 = vld [vmem:[%s1680_s3 + $0x8] sm:$0xff] (!%p1103_p4) }
  0x68   : > { %1268 = vset.pattern.permute.xlu1 (!%p1103_p4), %v1359_v50  ;;  %1267 = vset.pattern.permute.xlu0 (!%p1103_p4), %v1359_v50 }
  0x69   : > { %851 = vperm.xlu1 (!%p1103_p4), %1268, %v837_v48   ;;  %841 = vperm.xlu0 (!%p1103_p4), %1267, %v835_v49  }
  0x6a   : > { %763 = vmatpush1.bf16.msra.mxu1 %v1233_v53 }
  0x6b   : > { %764 = vmatprep.subr.bf16.mxu1 %v1234_v54 }
  0x6d   : > { %856 = vperm.xlu1 (!%p1103_p4), %1268, %v838_v51   ;;  %846 = vperm.xlu0 (!%p1103_p4), %1267, %v836_v52  }
  0x6e   : > { %765 = vmatpush1.bf16.msra.mxu1 %v1236_v55 }
  0x6f   : > { %766 = vmatprep.subr.bf16.mxu1 %v1237_v56 }
  0x72   : > { %767 = vmatpush1.bf16.msra.mxu1 %v1239_v57 }
  0x73   : > { %768 = vmatprep.subr.bf16.mxu1 %v1240_v58 }
  0x76   : > { %769 = vmatpush1.bf16.msra.mxu1 %v1242_v59 }
  0x77   : > { %770 = vmatprep.subr.bf16.mxu1 %v1243_v60 }
  0x7a   : > { %771 = vmatpush1.bf16.msra.mxu1 %v1245_v61 }
  0x7b   : > { %772 = vmatprep.subr.bf16.mxu1 %v1246_v62 }
  0x7e   : > { %773 = vmatpush1.bf16.msra.mxu1 %v1248_v63 }
  0x7f   : > { %774 = vmatprep.subr.bf16.mxu1 %v1249_v0 }
  0x82   : > { %775 = vmatpush1.bf16.msra.mxu1 %v1251_v1 }
  0x83   : > { %776 = vmatprep.subr.bf16.mxu1 %v1252_v2 }
  0x86   : > { %777 = vmatpush1.bf16.msra.mxu1 %v1254_v3 }
  0x87   : > { %778 = vmatprep.subr.bf16.mxu1 %v1255_v4 }
  0x8a   : > { %779 = vmatpush1.bf16.msra.mxu1 %v1257_v5 }
  0x8b   : > { %780 = vmatprep.subr.bf16.mxu1 %v1258_v6 }
  0x8e   : > { %781 = vmatpush1.bf16.msra.mxu1 %v1260_v7 }
  0x8f   : > { %782 = vmatprep.subr.bf16.mxu1 %v1261_v8 }
  0x92   : > { %783 = vmatpush1.bf16.msra.mxu1 %v1263_v9 }
  0x93   : > { %784 = vmatprep.subr.bf16.mxu1 %v1264_v10 }
  0x96   : > { %785 = vmatpush1.bf16.msra.mxu1 %v1266_v11 }
  0xe8   : > { %v852_v57 = vpop.permute.xlu1 (!%p1103_p4), %851  ;;  %v842_v58 = vpop.permute.xlu0 (!%p1103_p4), %841 }
  0xec   : > { %v857_v7 = vpop.permute.xlu1 (!%p1103_p4), %856  ;;  %v847_v8 = vpop.permute.xlu0 (!%p1103_p4), %846 }
 0x132   : > { %v531_v12 = vpop.f32.mrb[0].mxu0 }
 0x133   : > { %v533_v13 = vpop.f32.mrb[1].mxu0 }
 0x134   : > { %v535_v14 = vpop.f32.mrb[2].mxu0 }
 0x135   : > { %v558_v15 = vpack.c.bf16 %v535_v14, %v531_v12  ;;  %v537_v16 = vpop.f32.mrb[3].mxu0 }
 0x136   : > { %v559_v17 = vpack.c.bf16 %v537_v16, %v533_v13 }
 0x138   : > { %786 = vmatprep.mubr.bf16.mxu1 %v559_v17 }
 0x139   : > { %787 = vmatmul.mubr.bf16.vlgmr.msra.gmra.mrb[0].mxu1 %v558_v15 }
 0x13a   : > { %v541_v18 = vpop.f32.mrb[4].mxu0 }
 0x13b   : > { %v543_v19 = vpop.f32.mrb[5].mxu0 }
 0x13c   : > { %v545_v20 = vpop.f32.mrb[6].mxu0 }
 0x13d   : > { %v560_v21 = vpack.c.bf16 %v545_v20, %v541_v18  ;;  %v547_v22 = vpop.f32.mrb[7].mxu0 }
 0x13e   : > { %v561_v23 = vpack.c.bf16 %v547_v22, %v543_v19 }
 0x140   : > { %796 = vmatprep.mubr.bf16.mxu1 %v561_v23 }
 0x141   : > { %797 = vmatmul.mubr.bf16.gmra.mrb[4].mxu1 %v560_v21 }
 0x20c   : > { %v788_v26 = vpop.f32.mrb[0].mxu1 }
 0x20d   : > { %v807_v28 = vadd.f32 %v788_v26, %v550_v24  ;;  %v790_v29 = vpop.f32.mrb[1].mxu1 }
 0x20e   : > { %v808_v31 = vadd.f32 %v790_v29, %v551_v25  ;;  %v792_v32 = vpop.f32.mrb[2].mxu1 }
 0x20f   : > { %815 = vst [vmem:[#allocation2] sm:$0xff] %v807_v28  ;;  %v809_v33 = vadd.f32 %v792_v32, %v552_v27  ;;  %v794_v34 = vpop.f32.mrb[3].mxu1 }
 0x210   : > { %816 = vst [vmem:[#allocation2 + $0x8] sm:$0xff] %v808_v31  ;;  %v810_v35 = vadd.f32 %v794_v34, %v553_v30 }
 0x211   : > { %817 = vst [vmem:[#allocation2 + $0x10] sm:$0xff] %v809_v33 }
 0x212   : > { %818 = vst [vmem:[#allocation2 + $0x18] sm:$0xff] %v810_v35 }
 0x214   : > { %v798_v38 = vpop.f32.mrb[4].mxu1  ;;  %826 = sbr.rel (%p1103_p4) target bundleno = 553 (0x229), region = 120 }
 0x215   : > { %v811_v40 = vadd.f32 %v798_v38, %v554_v36  ;;  %v800_v41 = vpop.f32.mrb[5].mxu1 }
 0x216   : > { %v812_v43 = vadd.f32 %v800_v41, %v555_v37  ;;  %v802_v44 = vpop.f32.mrb[6].mxu1  ;;  %v827_v55 = vld [vmem:[#allocation2] sm:$0xff] (!%p1103_p4) }
 0x217   : > { %819 = vst [vmem:[#allocation2 + $0x20] sm:$0xff] %v811_v40  ;;  %v813_v45 = vadd.f32 %v802_v44, %v556_v39  ;;  %v804_v46 = vpop.f32.mrb[7].mxu1  ;;  %v828_v56 = vld [vmem:[#allocation2 + $0x8] sm:$0xff] (!%p1103_p4)  ;;  %v859_v61 = vadd.f32 (!%p1103_p4), %v842_v58, %v827_v55 }
 0x218   : > { %820 = vst [vmem:[#allocation2 + $0x28] sm:$0xff] %v812_v43  ;;  %v814_v47 = vadd.f32 %v804_v46, %v557_v42  ;;  %v860_v62 = vadd.f32 (!%p1103_p4), %v842_v58, %v828_v56  ;;  %v829_v5 = vld [vmem:[#allocation2 + $0x10] sm:$0xff] (!%p1103_p4) }
 0x219   : > { %821 = vst [vmem:[#allocation2 + $0x30] sm:$0xff] %v813_v45  ;;  %v867_v3 = vmax.f32 (!%p1103_p4), %v859_v61, 0.0  ;;  %v830_v6 = vld [vmem:[#allocation2 + $0x18] sm:$0xff] (!%p1103_p4)  ;;  %v861_v13 = vadd.f32 (!%p1103_p4), %v847_v8, %v829_v5 }
 0x21a   : > { %822 = vst [vmem:[#allocation2 + $0x38] sm:$0xff] %v814_v47  ;;  %v868_v4 = vmax.f32 (!%p1103_p4), %v860_v62, 0.0  ;;  %v862_v14 = vadd.f32 (!%p1103_p4), %v847_v8, %v830_v6 }
 0x21b   : > { %v869_v17 = vmax.f32 %v861_v13, 0.0 }
 0x21c   : > { %v1115_v10 = vpack.c.bf16 %v868_v4, %v867_v3  ;;  %v870_v18 = vmax.f32 %v862_v14, 0.0 }
 0x21e   : > { %v831_v53 = vld [vmem:[#allocation2 + $0x20] sm:$0xff]  ;;  %899 = vst [vmem:[%s1574_s30] sm:$0xff] %v1115_v10  ;;  %v1116_v20 = vpack.c.bf16 %v870_v18, %v869_v17 }
 0x21f   : > { %v832_v54 = vld [vmem:[#allocation2 + $0x28] sm:$0xff]  ;;  %v863_v59 = vadd.f32 %v852_v57, %v831_v53 }
 0x220   : > { %v864_v60 = vadd.f32 %v852_v57, %v832_v54  ;;  %v833_v63 = vld [vmem:[#allocation2 + $0x30] sm:$0xff]  ;;  %900 = vst [vmem:[%s1574_s30 + $0x8] sm:$0xff] %v1116_v20 }
 0x221   : > { %v834_v0 = vld [vmem:[#allocation2 + $0x38] sm:$0xff]  ;;  %v871_v1 = vmax.f32 %v863_v59, 0.0  ;;  %v865_v11 = vadd.f32 %v857_v7, %v833_v63 }
 0x222   : > { %v872_v2 = vmax.f32 %v864_v60, 0.0  ;;  %v866_v12 = vadd.f32 %v857_v7, %v834_v0 }
 0x223   : > { %v873_v15 = vmax.f32 %v865_v11, 0.0 }
 0x224   : > { %v1117_v9 = vpack.c.bf16 %v872_v2, %v871_v1  ;;  %v874_v16 = vmax.f32 %v866_v12, 0.0 }
 0x226   : > { %901 = vst [vmem:[%s1574_s30 + $0x10] sm:$0xff] %v1117_v9  ;;  %v1118_v19 = vpack.c.bf16 %v874_v16, %v873_v15 }
 0x228   : > { %902 = vst [vmem:[%s1574_s30 + $0x18] sm:$0xff] %v1118_v19 }
 0x229 PF: > { %909 = sbr.rel (!%p1479_p12) target bundleno = 561 (0x231), region = 124  ;;  %s1119_s29 = sshll.u32 (%p1479_p12), %s1343_s22, 3  ;;  %v946_v21 = vld [vmem:[%s1574_s30] sm:$0xff] (%p1479_p12)  ;;  %v948_v22 = vld [vmem:[%s1574_s30 + $0x8] sm:$0xff] (%p1479_p12) }
 0x22a   : > { %s912_s15 = scalar_lea.vmem (%p1479_p12), %s1681_s4, %s1119_s29 }
 0x22b   : > { %947 = vst [vmem:[%s912_s15] sm:$0xff] (%p1479_p12), %v946_v21  ;;  %949 = vst [vmem:[%s912_s15 + $0x10] sm:$0xff] (%p1479_p12), %v948_v22 }
 0x22d   : > { %v950_v23 = vld [vmem:[%s1574_s30 + $0x10] sm:$0xff] (%p1479_p12) }
 0x22e   : > { %951 = vst [vmem:[%s912_s15 + $0x20] sm:$0xff] (%p1479_p12), %v950_v23 }
 0x22f   : > { %v952_v24 = vld [vmem:[%s1574_s30 + $0x18] sm:$0xff] (%p1479_p12) }
 0x230   : > { %953 = vst [vmem:[%s912_s15 + $0x30] sm:$0xff] %v952_v24 }
 0x231 PF: > { %s14_s25 = sadd.s32 1, %s1355_s25   ;;  %s1691_s14 = sld [smem:[#allocation6_spill]] }
 0x232   : > { %p11_p5 = scmp.ge.s32.totalorder %s14_s25, 6   ;;  %s1692_s9 = sld [smem:[#allocation7_spill]] }
 0x233   : > { %s1693_s15 = smov %s1319_s16  ;;  %s1694_s16 = smov %s1477_s13 }
 0x234   : > { %s1695_s17 = smov %s1327_s18  ;;  %s1696_s18 = smov %s1474_s12 }
 0x235   : > { %s1697_s19 = smov %s1335_s20  ;;  %s1698_s20 = smov %s1460_s7 }
 0x236   : > { %s1699_s21 = smov %s1347_s23  ;;  %s1700_s22 = smov %s1351_s24 }
 0x237   : > { %s1701_s23 = smov %s1691_s14  ;;  %13 = sbr.rel (!%p11_p5) target bundleno = 8 (0x8), region = 201 }
 0x238   : > { %s1702_s24 = smov %s1692_s9 }

// kernel: gcn_forward.3
= control target key start
LH: loop header
LB: loop body
LE: loop exit
PB: predicated region body
PF: predicated region fallthrough
CT: control target
= control target key end

     0   :  { %s1797_s0 = inlined_call_operand.vmem [shape: bf16[32,512], index: 0, kind: input, shape index: {}]   ;;  %s1798_s1 = inlined_call_operand.vmem [shape: bf16[512,512], index: 1, kind: input, shape index: {}]   ;;  %s1799_s2 = inlined_call_operand.vmem [shape: bf16[32,32], index: 2, kind: input, shape index: {}]   ;;  %s1800_s3 = inlined_call_operand.vmem [shape: f32[32,1], index: 3, kind: input, shape index: {}]   ;;  %s1801_s4 = inlined_call_operand.vmem [shape: f32[32,512], index: 4, kind: input, shape index: {}]   ;;  %s1802_s5 = inlined_call_operand.vmem [shape: f32[32,512], index: 5, kind: output, shape index: {}]  }
   0x1   :  { %1806 = sst [smem:[#allocation11_spill]] %s1797_s0 }
   0x2   :  { %s1470_s18 = smov 0   ;;  %s1472_s19 = smov 0  }
   0x3   :  { %s1474_s20 = smov 0   ;;  %s1476_s21 = smov 0  }
   0x4   :  { %s1478_s22 = smov 0   ;;  %s1480_s23 = smov 0  }
   0x5   :  { %s1482_s24 = smov 0   ;;  %s1484_s25 = smov 0  }
   0x6   :  { %s1486_s26 = smov 0   ;;  %s1488_s27 = smov 0  }
   0x7   :  { %s1490_s28 = smov 0  }
   0x8 LB: > { %1807 = sst [smem:[#allocation7_spill]] %s1415_s23  ;;  %s1129_s29 = sadd.s32 4294967295, %s1435_s28   ;;  %s1435_s28 = sphi %s1490_s28, %s15_s28   ;;  %s1431_s27 = sphi %s1488_s27, %s1827_s27   ;;  %s1427_s26 = sphi %s1486_s26, %s1826_s26   ;;  %s1423_s25 = sphi %s1484_s25, %s1825_s25   ;;  %s1419_s24 = sphi %s1482_s24, %s1824_s24   ;;  %s1415_s23 = sphi %s1480_s23, %s1817_s23   ;;  %s1411_s22 = sphi %s1478_s22, %s1816_s22   ;;  %s1407_s21 = sphi %s1476_s21, %s1823_s21   ;;  %s1403_s20 = sphi %s1474_s20, %s1822_s20   ;;  %s1399_s19 = sphi %s1472_s19, %s1821_s19   ;;  %s1395_s18 = sphi %s1470_s18, %s1820_s18  }
   0x9   : > { %s24_s30 = sadd.s32 1, %s1427_s26  ;;  %s27_s6 = sadd.s32 1, %s1431_s27 }
   0xa   : > { %p25_p0 = scmp.ge.s32.totalorder %s24_s30, 2  ;;  %s34_s7 = sadd.s32 1, %s1415_s23 }
   0xb   : > { %p41_p1 = scmp.ne.s32.totalorder %s1415_s23, %s1411_s22  ;;  %p42_p2 = scmp.eq.s32.totalorder %s1435_s28, 0 }
   0xc   : > { %s1829_s30 = smov (%p25_p0, %s24_s30), 0  ;;  %s1831_s6 = smov (!%p25_p0, %s27_s6), %s1431_s27 }
   0xd   : > { %1808 = sst [smem:[#allocation8_spill]] %s1829_s30  ;;  %s31_s8 = ssub.s32 %s1427_s26, %s1829_s30 }
   0xe   : > { %p29_p3 = scmp.ge.s32.totalorder %s1831_s6, 2  ;;  %p32_p4 = scmp.eq.s32.totalorder %s31_s8, 0 }
   0xf   : > { %p1539_p5 = por %p42_p2, %p41_p1  ;;  %s62_s10 = sadd.s32 1, %s1407_s21 }
  0x10   : > { %s1833_s6 = smov (%p29_p3, %s1831_s6), 0  ;;  %p69_p6 = scmp.ne.s32.totalorder %s1407_s21, %s1403_s20 }
  0x11   : > { %1810 = sst [smem:[#allocation9_spill]] %s1833_s6  ;;  %s58_s12 = ssub.s32 %s1431_s27, %s1833_s6 }
  0x12   : > { %s1547_s11 = scalar_select %p32_p4, %s1415_s23, %s34_s7  }
  0x13   : > { %s59_s13 = sor.u32 %s58_s12, %s31_s8  ;;  %p128_p7 = scmp.eq.s32.totalorder %s58_s12, 0 }
  0x14   : > { %1811 = sst [smem:[#allocation10_spill]] %s1547_s11  ;;  %p60_p8 = scmp.eq.s32.totalorder %s59_s13, 0 }
  0x15   : > { %p1555_p9 = por %p69_p6, %p42_p2  ;;  %s130_s15 = sadd.s32 1, %s1399_s19 }
  0x16   : > { %p137_p10 = scmp.ne.s32.totalorder %s1399_s19, %s1395_s18  ;;  %p167_p12 = scmp.eq.s32.totalorder %s1129_s29, 3 }
  0x17   : > { %s1563_s16 = scalar_select %p60_p8, %s1407_s21, %s62_s10  }
  0x18   : > { %s1566_s17 = scalar_select %p128_p7, %s1399_s19, %s130_s15  }
  0x19   : > { %p1570_p11 = por %p137_p10, %p42_p2  ;;  %p1574_p13 = por %p167_p12, %p137_p10 }
  0x1a   : > { %p1132_p0 = scmp.ge.s32.totalorder %s1435_s28, 4 }
  0x1c   : > { %195 = sbr.rel (%p1132_p0) target bundleno = 78 (0x4e), region = 24 }
  0x23   : > { %198 = sbr.rel (!%p1539_p5) target bundleno = 47 (0x2f), region = 28  ;;  %s200_s10 = sand.u32 (%p1539_p5), 1, %s1415_s23  }
  0x24   : > { %s1196_s12 = sshll.u32 (%p1539_p5), %s1427_s26, 3  ;;  %s1133_s13 = sshll.u32 (%p1539_p5), %s200_s10, 5 }
  0x25   : > { %s1815_s0 = sld [smem:[#allocation11_spill]] (%p1539_p5)  ;;  %s202_s29 = scalar_lea.vmem (%p1539_p5), [#allocation3], %s1133_s13 }
  0x2b   : > { %s205_s30 = scalar_lea.vmem %s1815_s0, %s1196_s12 }
  0x2c   : > { %v239_v0 = vld [vmem:[%s205_s30] sm:$0xff]  ;;  %v241_v1 = vld [vmem:[%s205_s30 + $0x10] sm:$0xff] }
  0x2d   : > { %v243_v2 = vld [vmem:[%s205_s30 + $0x20] sm:$0xff]  ;;  %240 = vst [vmem:[%s202_s29] sm:$0xff] %v239_v0  ;;  %242 = vst [vmem:[%s202_s29 + $0x8] sm:$0xff] %v241_v1  ;;  %v245_v3 = vld [vmem:[%s205_s30 + $0x30] sm:$0xff] }
  0x2e   : > { %244 = vst [vmem:[%s202_s29 + $0x10] sm:$0xff] %v243_v2  ;;  %246 = vst [vmem:[%s202_s29 + $0x18] sm:$0xff] %v245_v3 }
  0x2f PF: > { %252 = sbr.rel (!%p1555_p9) target bundleno = 70 (0x46), region = 66  ;;  %s254_s9 = sand.u32 (%p1555_p9), 1, %s1407_s21  }
  0x30   : > { %s1138_s10 = sshll.u32 (%p1555_p9), %s1431_s27, 1  ;;  %s1136_s6 = sshll.u32 (%p1555_p9), %s254_s9, 8 }
  0x31   : > { %s1197_s12 = sshll.u32 (%p1555_p9), %s1427_s26, 7  ;;  %s1599_s30 = scalar_lea.vmem (%p1555_p9), [#allocation4], %s1136_s6 }
  0x32   : > { %s260_s15 = sadd.s32 (%p1555_p9), %s1197_s12, %s1138_s10 }
  0x33   : > { %s1140_s0 = sshll.u32 (%p1555_p9), %s260_s15, 2 }
  0x34   : > { %s1594_s23 = scalar_lea.vmem (%p1555_p9), %s1798_s1, %s1140_s0 }
  0x35   : > { %v352_v4 = vld [vmem:[%s1594_s23] sm:$0xff] (%p1555_p9)  ;;  %v354_v5 = vld [vmem:[%s1594_s23 + $0x10] sm:$0xff] (%p1555_p9) }
  0x36   : > { %v356_v6 = vld [vmem:[%s1594_s23 + $0x20] sm:$0xff]  ;;  %353 = vst [vmem:[%s1599_s30] sm:$0xff] %v352_v4  ;;  %355 = vst [vmem:[%s1599_s30 + $0x8] sm:$0xff] %v354_v5  ;;  %v358_v7 = vld [vmem:[%s1594_s23 + $0x30] sm:$0xff] }
  0x37   : > { %357 = vst [vmem:[%s1599_s30 + $0x10] sm:$0xff] %v356_v6  ;;  %v360_v8 = vld [vmem:[%s1594_s23 + $0x40] sm:$0xff]  ;;  %v362_v9 = vld [vmem:[%s1594_s23 + $0x50] sm:$0xff]  ;;  %359 = vst [vmem:[%s1599_s30 + $0x18] sm:$0xff] %v358_v7 }
  0x38   : > { %361 = vst [vmem:[%s1599_s30 + $0x20] sm:$0xff] %v360_v8  ;;  %363 = vst [vmem:[%s1599_s30 + $0x28] sm:$0xff] %v362_v9  ;;  %v364_v10 = vld [vmem:[%s1594_s23 + $0x60] sm:$0xff]  ;;  %v366_v11 = vld [vmem:[%s1594_s23 + $0x70] sm:$0xff] }
  0x39   : > { %v368_v12 = vld [vmem:[%s1594_s23 + $0x80] sm:$0xff]  ;;  %365 = vst [vmem:[%s1599_s30 + $0x30] sm:$0xff] %v364_v10  ;;  %367 = vst [vmem:[%s1599_s30 + $0x38] sm:$0xff] %v366_v11  ;;  %v370_v13 = vld [vmem:[%s1594_s23 + $0x90] sm:$0xff] }
  0x3a   : > { %369 = vst [vmem:[%s1599_s30 + $0x40] sm:$0xff] %v368_v12  ;;  %v372_v14 = vld [vmem:[%s1594_s23 + $0xa0] sm:$0xff]  ;;  %v374_v15 = vld [vmem:[%s1594_s23 + $0xb0] sm:$0xff]  ;;  %371 = vst [vmem:[%s1599_s30 + $0x48] sm:$0xff] %v370_v13 }
  0x3b   : > { %373 = vst [vmem:[%s1599_s30 + $0x50] sm:$0xff] %v372_v14  ;;  %375 = vst [vmem:[%s1599_s30 + $0x58] sm:$0xff] %v374_v15  ;;  %v376_v16 = vld [vmem:[%s1594_s23 + $0xc0] sm:$0xff]  ;;  %v378_v17 = vld [vmem:[%s1594_s23 + $0xd0] sm:$0xff] }
  0x3c   : > { %v380_v18 = vld [vmem:[%s1594_s23 + $0xe0] sm:$0xff]  ;;  %377 = vst [vmem:[%s1599_s30 + $0x60] sm:$0xff] %v376_v16  ;;  %379 = vst [vmem:[%s1599_s30 + $0x68] sm:$0xff] %v378_v17  ;;  %v382_v19 = vld [vmem:[%s1594_s23 + $0xf0] sm:$0xff] }
  0x3d   : > { %381 = vst [vmem:[%s1599_s30 + $0x70] sm:$0xff] %v380_v18  ;;  %v384_v20 = vld [vmem:[%s1594_s23 + $0x100] sm:$0xff]  ;;  %v386_v21 = vld [vmem:[%s1594_s23 + $0x110] sm:$0xff]  ;;  %383 = vst [vmem:[%s1599_s30 + $0x78] sm:$0xff] %v382_v19 }
  0x3e   : > { %385 = vst [vmem:[%s1599_s30 + $0x80] sm:$0xff] %v384_v20  ;;  %387 = vst [vmem:[%s1599_s30 + $0x88] sm:$0xff] %v386_v21  ;;  %v388_v22 = vld [vmem:[%s1594_s23 + $0x120] sm:$0xff]  ;;  %v390_v23 = vld [vmem:[%s1594_s23 + $0x130] sm:$0xff] }
  0x3f   : > { %v392_v24 = vld [vmem:[%s1594_s23 + $0x140] sm:$0xff]  ;;  %389 = vst [vmem:[%s1599_s30 + $0x90] sm:$0xff] %v388_v22  ;;  %391 = vst [vmem:[%s1599_s30 + $0x98] sm:$0xff] %v390_v23  ;;  %v394_v25 = vld [vmem:[%s1594_s23 + $0x150] sm:$0xff] }
  0x40   : > { %393 = vst [vmem:[%s1599_s30 + $0xa0] sm:$0xff] %v392_v24  ;;  %v396_v26 = vld [vmem:[%s1594_s23 + $0x160] sm:$0xff]  ;;  %v398_v27 = vld [vmem:[%s1594_s23 + $0x170] sm:$0xff]  ;;  %395 = vst [vmem:[%s1599_s30 + $0xa8] sm:$0xff] %v394_v25 }
  0x41   : > { %397 = vst [vmem:[%s1599_s30 + $0xb0] sm:$0xff] %v396_v26  ;;  %399 = vst [vmem:[%s1599_s30 + $0xb8] sm:$0xff] %v398_v27  ;;  %v400_v28 = vld [vmem:[%s1594_s23 + $0x180] sm:$0xff]  ;;  %v402_v29 = vld [vmem:[%s1594_s23 + $0x190] sm:$0xff] }
  0x42   : > { %v404_v30 = vld [vmem:[%s1594_s23 + $0x1a0] sm:$0xff]  ;;  %401 = vst [vmem:[%s1599_s30 + $0xc0] sm:$0xff] %v400_v28  ;;  %403 = vst [vmem:[%s1599_s30 + $0xc8] sm:$0xff] %v402_v29  ;;  %v406_v31 = vld [vmem:[%s1594_s23 + $0x1b0] sm:$0xff] }
  0x43   : > { %405 = vst [vmem:[%s1599_s30 + $0xd0] sm:$0xff] %v404_v30  ;;  %v408_v32 = vld [vmem:[%s1594_s23 + $0x1c0] sm:$0xff]  ;;  %v410_v33 = vld [vmem:[%s1594_s23 + $0x1d0] sm:$0xff]  ;;  %407 = vst [vmem:[%s1599_s30 + $0xd8] sm:$0xff] %v406_v31 }
  0x44   : > { %409 = vst [vmem:[%s1599_s30 + $0xe0] sm:$0xff] %v408_v32  ;;  %411 = vst [vmem:[%s1599_s30 + $0xe8] sm:$0xff] %v410_v33  ;;  %v412_v34 = vld [vmem:[%s1594_s23 + $0x1e0] sm:$0xff]  ;;  %v414_v35 = vld [vmem:[%s1594_s23 + $0x1f0] sm:$0xff] }
  0x45   : > { %413 = vst [vmem:[%s1599_s30 + $0xf0] sm:$0xff] %v412_v34  ;;  %415 = vst [vmem:[%s1599_s30 + $0xf8] sm:$0xff] %v414_v35 }
  0x46 PF: > { %421 = sbr.rel (!%p1570_p11) target bundleno = 78 (0x4e), region = 104  ;;  %s423_s0 = sand.u32 (%p1570_p11), 1, %s1399_s19  }
  0x47   : > { %s1198_s11 = sshll.u32 (%p1570_p11), %s1431_s27, 4  ;;  %s1141_s14 = sshll.u32 (%p1570_p11), %s423_s0, 6 }
  0x48   : > { %s428_s10 = scalar_lea.vmem (%p1570_p11), %s1801_s4, %s1198_s11  ;;  %s425_s6 = scalar_lea.vmem (%p1570_p11), [#allocation5], %s1141_s14 }
  0x49   : > { %v441_v36 = vld [vmem:[%s428_s10] sm:$0xff] (%p1570_p11)  ;;  %v443_v37 = vld [vmem:[%s428_s10 + $0x8] sm:$0xff] (%p1570_p11) }
  0x4a   : > { %v445_v38 = vld [vmem:[%s428_s10 + $0x20] sm:$0xff] (%p1570_p11)  ;;  %442 = vst [vmem:[%s425_s6] sm:$0xff] (%p1570_p11), %v441_v36  ;;  %444 = vst [vmem:[%s425_s6 + $0x8] sm:$0xff] (%p1570_p11), %v443_v37  ;;  %v447_v39 = vld [vmem:[%s428_s10 + $0x28] sm:$0xff] (%p1570_p11) }
  0x4b   : > { %446 = vst [vmem:[%s425_s6 + $0x10] sm:$0xff] (%p1570_p11), %v445_v38  ;;  %v449_v40 = vld [vmem:[%s428_s10 + $0x40] sm:$0xff] (%p1570_p11)  ;;  %v451_v41 = vld [vmem:[%s428_s10 + $0x48] sm:$0xff] (%p1570_p11)  ;;  %448 = vst [vmem:[%s425_s6 + $0x18] sm:$0xff] (%p1570_p11), %v447_v39 }
  0x4c   : > { %450 = vst [vmem:[%s425_s6 + $0x20] sm:$0xff] (%p1570_p11), %v449_v40  ;;  %452 = vst [vmem:[%s425_s6 + $0x28] sm:$0xff] (%p1570_p11), %v451_v41  ;;  %v453_v42 = vld [vmem:[%s428_s10 + $0x60] sm:$0xff] (%p1570_p11)  ;;  %v455_v43 = vld [vmem:[%s428_s10 + $0x68] sm:$0xff] (%p1570_p11) }
  0x4d   : > { %454 = vst [vmem:[%s425_s6 + $0x30] sm:$0xff] %v453_v42  ;;  %456 = vst [vmem:[%s425_s6 + $0x38] sm:$0xff] %v455_v43 }
  0x4e PF: > { %p1144_p1 = scmp.ge.s32.totalorder %s1435_s28, 1  ;;  %p461_p2 = scmp.lt.s32.totalorder %s1435_s28, 5 }
  0x50   : > { %p462_p3 = pnand %p1144_p1, %p461_p2 }
  0x51   : > { %s468_s23 = sand.u32 (!%p462_p3), 1, %s1411_s22   ;;  %s475_s7 = sand.u32 (!%p462_p3), 1, %s1403_s20  }
  0x52   : > { %465 = sbr.rel (%p462_p3) target bundleno = 571 (0x23b), region = 127  ;;  %s1145_s12 = sshll.u32 (!%p462_p3), %s468_s23, 5 }
  0x53   : > { %s1146_s15 = sshll.u32 (!%p462_p3), %s475_s7, 8  ;;  %s482_s13 = sand.u32 (!%p462_p3), 1, %s1395_s18  }
  0x54   : > { %s1147_s30 = sshll.u32 (!%p462_p3), %s482_s13, 6  ;;  %s470_s0 = scalar_lea.vmem (!%p462_p3), [#allocation3], %s1145_s12 }
  0x55   : > { %s1674_s11 = scalar_lea.vmem (!%p462_p3), [#allocation4], %s1146_s15  ;;  %s1676_s14 = scalar_lea.vmem (!%p462_p3), [#allocation5], %s1147_s30 }
  0x56   : > { %s1678_s29 = scalar_lea.vmem (!%p462_p3), [#allocation6], %s1147_s30  ;;  %p1149_p4 = scmp.ne.s32.totalorder (!%p462_p3), %s1419_s24, 0 }
  0x59   : > { %525 = sbr.rel (%p1149_p4) target bundleno = 96 (0x60), region = 143  ;;  %v1437_v44 = vmov (!%p1149_p4), 0.0  }
  0x5a   : > { %526 = vst [vmem:[#allocation2] sm:$0xff] (!%p1149_p4), %v1437_v44  ;;  %527 = vst [vmem:[#allocation2 + $0x8] sm:$0xff] (!%p1149_p4), %v1437_v44 }
  0x5b   : > { %528 = vst [vmem:[#allocation2 + $0x10] sm:$0xff] (!%p1149_p4), %v1437_v44  ;;  %529 = vst [vmem:[#allocation2 + $0x18] sm:$0xff] (!%p1149_p4), %v1437_v44 }
  0x5c   : > { %530 = vst [vmem:[#allocation2 + $0x20] sm:$0xff] (!%p1149_p4), %v1437_v44  ;;  %531 = vst [vmem:[#allocation2 + $0x28] sm:$0xff] (!%p1149_p4), %v1437_v44 }
  0x5d   : > { %532 = vst [vmem:[#allocation2 + $0x30] sm:$0xff] (!%p1149_p4), %v1437_v44  ;;  %533 = vst [vmem:[#allocation2 + $0x38] sm:$0xff] (!%p1149_p4), %v1437_v44 }
  0x60 PF: > { %v1291_v45 = vld [vmem:[%s470_s0 + $0x4] ss:$8 sps:$4 sm:$0xff]   ;;  %v1293_v46 = vld [vmem:[%s470_s0] ss:$8 sps:$4 sm:$0xff]   ;;  %v1438_v47 = vmov 0   ;;  %vm572_vm0 = vcmask 261120  }
  0x61   : > { %611 = vmatprep.mubr.bf16.mxu0 %v1438_v47  ;;  %579 = vmatprep.subr.bf16.mxu0 %v1291_v45  ;;  %v1294_v48 = vld [vmem:[%s470_s0 + $0x14] ss:$8 sps:$4 sm:$0xff]   ;;  %v1296_v49 = vld [vmem:[%s470_s0 + $0x10] ss:$8 sps:$4 sm:$0xff]   ;;  %v1297_v50 = vld [vmem:[%s1799_s2] sm:$0xff]   ;;  %p1190_p5 = scmp.ne.s32.totalorder %s1419_s24, 1 }
  0x62   : > { %580 = vmatpush1.bf16.msra.mxu0 %v1293_v46  ;;  %v1299_v51 = vld [vmem:[%s1674_s11 + $0x4] ss:$8 sps:$4 sm:$0xff]   ;;  %v1301_v52 = vld [vmem:[%s1674_s11] ss:$8 sps:$4 sm:$0xff]   ;;  %v1302_v53 = vld [vmem:[%s1674_s11 + $0x14] ss:$8 sps:$4 sm:$0xff]  }
  0x63   : > { %581 = vmatprep.subr.bf16.mxu0 %v1294_v48  ;;  %836 = vmatprep.subr.bf16.mxu1 %v1299_v51  ;;  %v1304_v54 = vld [vmem:[%s1674_s11 + $0x10] ss:$8 sps:$4 sm:$0xff]   ;;  %v1305_v55 = vld [vmem:[%s1674_s11 + $0x24] ss:$8 sps:$4 sm:$0xff]   ;;  %v1307_v56 = vld [vmem:[%s1674_s11 + $0x20] ss:$8 sps:$4 sm:$0xff]  }
  0x64   : > { %837 = vmatpush1.bf16.msra.mxu1 %v1301_v52  ;;  %v1308_v57 = vld [vmem:[%s1674_s11 + $0x34] ss:$8 sps:$4 sm:$0xff]   ;;  %v1298_v58 = vld [vmem:[%s1799_s2 + $0x8] sm:$0xff]   ;;  %v1310_v59 = vld [vmem:[%s1674_s11 + $0x30] ss:$8 sps:$4 sm:$0xff]  }
  0x65   : > { %838 = vmatprep.subr.bf16.mxu1 %v1302_v53  ;;  %v1311_v60 = vld [vmem:[%s1674_s11 + $0x44] ss:$8 sps:$4 sm:$0xff]   ;;  %v1313_v61 = vld [vmem:[%s1674_s11 + $0x40] ss:$8 sps:$4 sm:$0xff]   ;;  %v1314_v62 = vld [vmem:[%s1674_s11 + $0x54] ss:$8 sps:$4 sm:$0xff]  }
  0x66   : > { %582 = vmatpush1.bf16.msra.mxu0 %v1296_v49  ;;  %v1316_v63 = vld [vmem:[%s1674_s11 + $0x50] ss:$8 sps:$4 sm:$0xff]   ;;  %v1317_v0 = vld [vmem:[%s1674_s11 + $0x64] ss:$8 sps:$4 sm:$0xff]   ;;  %v1319_v1 = vld [vmem:[%s1674_s11 + $0x60] ss:$8 sps:$4 sm:$0xff]  }
  0x67   : > { %v1320_v2 = vld [vmem:[%s1674_s11 + $0x74] ss:$8 sps:$4 sm:$0xff]   ;;  %v1322_v3 = vld [vmem:[%s1674_s11 + $0x70] ss:$8 sps:$4 sm:$0xff]   ;;  %v1323_v4 = vld [vmem:[%s1674_s11 + $0x84] ss:$8 sps:$4 sm:$0xff]  }
  0x68   : > { %839 = vmatpush1.bf16.msra.mxu1 %v1304_v54  ;;  %v1325_v5 = vld [vmem:[%s1674_s11 + $0x80] ss:$8 sps:$4 sm:$0xff]   ;;  %v1326_v6 = vld [vmem:[%s1674_s11 + $0x94] ss:$8 sps:$4 sm:$0xff]   ;;  %v1328_v7 = vld [vmem:[%s1674_s11 + $0x90] ss:$8 sps:$4 sm:$0xff]  }
  0x69   : > { %1156 = vmatmul.mubr.msk.bf16.vlgmr.msra.gmra.mrb[0].mxu0 %vm572_vm0, %v1297_v50  ;;  %840 = vmatprep.subr.bf16.mxu1 %v1305_v55  ;;  %v1329_v8 = vld [vmem:[%s1674_s11 + $0xa4] ss:$8 sps:$4 sm:$0xff]   ;;  %v1331_v9 = vld [vmem:[%s1674_s11 + $0xa0] ss:$8 sps:$4 sm:$0xff]   ;;  %v1332_v10 = vld [vmem:[%s1674_s11 + $0xb4] ss:$8 sps:$4 sm:$0xff]  }
  0x6a   : > { %621 = vmatprep.mubr.bf16.mxu0 %v1438_v47  ;;  %v1334_v11 = vld [vmem:[%s1674_s11 + $0xb0] ss:$8 sps:$4 sm:$0xff]   ;;  %v1335_v12 = vld [vmem:[%s1674_s11 + $0xc4] ss:$8 sps:$4 sm:$0xff]   ;;  %v1337_v13 = vld [vmem:[%s1674_s11 + $0xc0] ss:$8 sps:$4 sm:$0xff]  }
  0x6b   : > { %v1338_v14 = vld [vmem:[%s1674_s11 + $0xd4] ss:$8 sps:$4 sm:$0xff]   ;;  %v1340_v15 = vld [vmem:[%s1674_s11 + $0xd0] ss:$8 sps:$4 sm:$0xff]   ;;  %v1341_v16 = vld [vmem:[%s1674_s11 + $0xe4] ss:$8 sps:$4 sm:$0xff]  }
  0x6c   : > { %841 = vmatpush1.bf16.msra.mxu1 %v1307_v56  ;;  %v1343_v17 = vld [vmem:[%s1674_s11 + $0xe0] ss:$8 sps:$4 sm:$0xff]   ;;  %v1344_v18 = vld [vmem:[%s1674_s11 + $0xf4] ss:$8 sps:$4 sm:$0xff]   ;;  %v1346_v19 = vld [vmem:[%s1674_s11 + $0xf0] ss:$8 sps:$4 sm:$0xff]  }
  0x6d   : > { %842 = vmatprep.subr.bf16.mxu1 %v1308_v57  ;;  %v632_v32 = vld [vmem:[#allocation2] sm:$0xff]  ;;  %v633_v33 = vld [vmem:[#allocation2 + $0x8] sm:$0xff]  ;;  %v634_v35 = vld [vmem:[#allocation2 + $0x10] sm:$0xff] }
  0x6e   : > { %v635_v38 = vld [vmem:[#allocation2 + $0x18] sm:$0xff]  ;;  %v636_v44 = vld [vmem:[#allocation2 + $0x20] sm:$0xff]  ;;  %v637_v45 = vld [vmem:[#allocation2 + $0x28] sm:$0xff] }
  0x6f   : > { %v638_v47 = vld [vmem:[#allocation2 + $0x30] sm:$0xff]  ;;  %v639_v50 = vld [vmem:[#allocation2 + $0x38] sm:$0xff]  ;;  %v917_v57 = vld [vmem:[%s1800_s3] sm:$0xff] (!%p1190_p5) }
  0x70   : > { %843 = vmatpush1.bf16.msra.mxu1 %v1310_v59  ;;  %v919_v56 = vld [vmem:[%s1800_s3 + $0x10] sm:$0xff] (!%p1190_p5)  ;;  %v920_v59 = vld [vmem:[%s1800_s3 + $0x18] sm:$0xff] (!%p1190_p5) }
  0x71   : > { %1157 = vmatmul.mubr.msk.bf16.gmra.mrb[4].mxu0 %vm572_vm0, %v1298_v58  ;;  %844 = vmatprep.subr.bf16.mxu1 %v1311_v60  ;;  %v1439_v58 = vmov (!%p1190_p5), 0   ;;  %v918_v60 = vld [vmem:[%s1800_s3 + $0x8] sm:$0xff] (!%p1190_p5) }
  0x72   : > { %1348 = vset.pattern.permute.xlu1 (!%p1190_p5), %v1439_v58  ;;  %1347 = vset.pattern.permute.xlu0 (!%p1190_p5), %v1439_v58 }
  0x73   : > { %933 = vperm.xlu1 (!%p1190_p5), %1348, %v919_v56   ;;  %923 = vperm.xlu0 (!%p1190_p5), %1347, %v917_v57  }
  0x74   : > { %845 = vmatpush1.bf16.msra.mxu1 %v1313_v61 }
  0x75   : > { %846 = vmatprep.subr.bf16.mxu1 %v1314_v62 }
  0x77   : > { %938 = vperm.xlu1 (!%p1190_p5), %1348, %v920_v59   ;;  %928 = vperm.xlu0 (!%p1190_p5), %1347, %v918_v60  }
  0x78   : > { %847 = vmatpush1.bf16.msra.mxu1 %v1316_v63 }
  0x79   : > { %848 = vmatprep.subr.bf16.mxu1 %v1317_v0 }
  0x7c   : > { %849 = vmatpush1.bf16.msra.mxu1 %v1319_v1  ;;  %v953_v1 = vld [vmem:[%s1676_s14 + $0x20] sm:$0xff] (!%p1190_p5) }
  0x7d   : > { %850 = vmatprep.subr.bf16.mxu1 %v1320_v2  ;;  %v954_v2 = vld [vmem:[%s1676_s14 + $0x28] sm:$0xff] (!%p1190_p5) }
  0x80   : > { %851 = vmatpush1.bf16.msra.mxu1 %v1322_v3 }
  0x81   : > { %852 = vmatprep.subr.bf16.mxu1 %v1323_v4  ;;  %v949_v4 = vld [vmem:[%s1676_s14] sm:$0xff] (!%p1190_p5) }
  0x84   : > { %853 = vmatpush1.bf16.msra.mxu1 %v1325_v5  ;;  %v950_v5 = vld [vmem:[%s1676_s14 + $0x8] sm:$0xff] (!%p1190_p5) }
  0x85   : > { %854 = vmatprep.subr.bf16.mxu1 %v1326_v6 }
  0x88   : > { %855 = vmatpush1.bf16.msra.mxu1 %v1328_v7 }
  0x89   : > { %856 = vmatprep.subr.bf16.mxu1 %v1329_v8 }
  0x8c   : > { %857 = vmatpush1.bf16.msra.mxu1 %v1331_v9 }
  0x8d   : > { %858 = vmatprep.subr.bf16.mxu1 %v1332_v10 }
  0x90   : > { %859 = vmatpush1.bf16.msra.mxu1 %v1334_v11 }
  0x91   : > { %860 = vmatprep.subr.bf16.mxu1 %v1335_v12 }
  0x94   : > { %861 = vmatpush1.bf16.msra.mxu1 %v1337_v13 }
  0x95   : > { %862 = vmatprep.subr.bf16.mxu1 %v1338_v14 }
  0x98   : > { %863 = vmatpush1.bf16.msra.mxu1 %v1340_v15 }
  0x99   : > { %864 = vmatprep.subr.bf16.mxu1 %v1341_v16 }
  0x9c   : > { %865 = vmatpush1.bf16.msra.mxu1 %v1343_v17 }
  0x9d   : > { %866 = vmatprep.subr.bf16.mxu1 %v1344_v18 }
  0xa0   : > { %867 = vmatpush1.bf16.msra.mxu1 %v1346_v19  ;;  %v955_v19 = vld [vmem:[%s1676_s14 + $0x30] sm:$0xff] (!%p1190_p5) }
  0xf2   : > { %v934_v3 = vpop.permute.xlu1 (!%p1190_p5), %933  ;;  %v924_v6 = vpop.permute.xlu0 (!%p1190_p5), %923 }
 0x13c   : > { %v613_v20 = vpop.f32.mrb[0].mxu0 }
 0x13d   : > { %v615_v21 = vpop.f32.mrb[1].mxu0 }
 0x13e   : > { %v617_v22 = vpop.f32.mrb[2].mxu0 }
 0x13f   : > { %v640_v23 = vpack.c.bf16 %v617_v22, %v613_v20  ;;  %v619_v24 = vpop.f32.mrb[3].mxu0  ;;  %v956_v20 = vld [vmem:[%s1676_s14 + $0x38] sm:$0xff] (!%p1190_p5)  ;;  %v929_v22 = vpop.permute.xlu0 (!%p1190_p5), %928 }
 0x140   : > { %v641_v25 = vpack.c.bf16 %v619_v24, %v615_v21  ;;  %v939_v21 = vpop.permute.xlu1 (!%p1190_p5), %938 }
 0x142   : > { %868 = vmatprep.mubr.bf16.mxu1 %v641_v25 }
 0x143   : > { %869 = vmatmul.mubr.bf16.vlgmr.msra.gmra.mrb[0].mxu1 %v640_v23 }
 0x144   : > { %v623_v26 = vpop.f32.mrb[4].mxu0 }
 0x145   : > { %v625_v27 = vpop.f32.mrb[5].mxu0 }
 0x146   : > { %v627_v28 = vpop.f32.mrb[6].mxu0 }
 0x147   : > { %v642_v29 = vpack.c.bf16 %v627_v28, %v623_v26  ;;  %v629_v30 = vpop.f32.mrb[7].mxu0  ;;  %v952_v28 = vld [vmem:[%s1676_s14 + $0x18] sm:$0xff] (!%p1190_p5) }
 0x148   : > { %v643_v31 = vpack.c.bf16 %v629_v30, %v625_v27  ;;  %v951_v27 = vld [vmem:[%s1676_s14 + $0x10] sm:$0xff] (!%p1190_p5) }
 0x14a   : > { %878 = vmatprep.mubr.bf16.mxu1 %v643_v31 }
 0x14b   : > { %879 = vmatmul.mubr.bf16.gmra.mrb[4].mxu1 %v642_v29 }
 0x216   : > { %v870_v34 = vpop.f32.mrb[0].mxu1 }
 0x217   : > { %v889_v36 = vadd.f32 %v870_v34, %v632_v32  ;;  %v872_v37 = vpop.f32.mrb[1].mxu1 }
 0x218   : > { %v890_v39 = vadd.f32 %v872_v37, %v633_v33  ;;  %v874_v40 = vpop.f32.mrb[2].mxu1 }
 0x219   : > { %897 = vst [vmem:[#allocation2] sm:$0xff] %v889_v36  ;;  %v891_v41 = vadd.f32 %v874_v40, %v634_v35  ;;  %v876_v42 = vpop.f32.mrb[3].mxu1 }
 0x21a   : > { %898 = vst [vmem:[#allocation2 + $0x8] sm:$0xff] %v890_v39  ;;  %v892_v43 = vadd.f32 %v876_v42, %v635_v38 }
 0x21b   : > { %899 = vst [vmem:[#allocation2 + $0x10] sm:$0xff] %v891_v41 }
 0x21c   : > { %900 = vst [vmem:[#allocation2 + $0x18] sm:$0xff] %v892_v43 }
 0x21e   : > { %v880_v46 = vpop.f32.mrb[4].mxu1  ;;  %908 = sbr.rel (%p1190_p5) target bundleno = 563 (0x233), region = 147 }
 0x21f   : > { %v893_v48 = vadd.f32 %v880_v46, %v636_v44  ;;  %v882_v49 = vpop.f32.mrb[5].mxu1 }
 0x220   : > { %v894_v51 = vadd.f32 %v882_v49, %v637_v45  ;;  %v884_v52 = vpop.f32.mrb[6].mxu1  ;;  %v909_v63 = vld [vmem:[#allocation2] sm:$0xff] (!%p1190_p5) }
 0x221   : > { %901 = vst [vmem:[#allocation2 + $0x20] sm:$0xff] %v893_v48  ;;  %v895_v53 = vadd.f32 %v884_v52, %v638_v47  ;;  %v886_v54 = vpop.f32.mrb[7].mxu1  ;;  %v910_v0 = vld [vmem:[#allocation2 + $0x8] sm:$0xff] (!%p1190_p5)  ;;  %v941_v9 = vadd.f32 (!%p1190_p5), %v924_v6, %v909_v63 }
 0x222   : > { %902 = vst [vmem:[#allocation2 + $0x28] sm:$0xff] %v894_v51  ;;  %v896_v55 = vadd.f32 %v886_v54, %v639_v50  ;;  %v942_v10 = vadd.f32 (!%p1190_p5), %v924_v6, %v910_v0  ;;  %v911_v17 = vld [vmem:[#allocation2 + $0x10] sm:$0xff] (!%p1190_p5) }
 0x223   : > { %903 = vst [vmem:[#allocation2 + $0x30] sm:$0xff] %v895_v53  ;;  %v957_v14 = vadd.f32 (!%p1190_p5), %v949_v4, %v941_v9  ;;  %v912_v18 = vld [vmem:[#allocation2 + $0x18] sm:$0xff] (!%p1190_p5)  ;;  %v943_v31 = vadd.f32 (!%p1190_p5), %v929_v22, %v911_v17 }
 0x224   : > { %904 = vst [vmem:[#allocation2 + $0x38] sm:$0xff] %v896_v55  ;;  %v958_v15 = vadd.f32 (!%p1190_p5), %v950_v5, %v942_v10  ;;  %v944_v32 = vadd.f32 (!%p1190_p5), %v929_v22, %v912_v18 }
 0x225   : > { %v965_v25 = vmax.f32 %v957_v14, 0.0  ;;  %v959_v35 = vadd.f32 %v951_v27, %v943_v31 }
 0x226   : > { %v966_v26 = vmax.f32 %v958_v15, 0.0  ;;  %v960_v36 = vadd.f32 %v952_v28, %v944_v32 }
 0x227   : > { %973 = vst [vmem:[%s1678_s29] sm:$0xff] %v965_v25  ;;  %v967_v39 = vmax.f32 %v959_v35, 0.0 }
 0x228   : > { %v913_v61 = vld [vmem:[#allocation2 + $0x20] sm:$0xff]  ;;  %974 = vst [vmem:[%s1678_s29 + $0x8] sm:$0xff] %v966_v26  ;;  %v968_v40 = vmax.f32 %v960_v36, 0.0 }
 0x229   : > { %v914_v62 = vld [vmem:[#allocation2 + $0x28] sm:$0xff]  ;;  %v945_v7 = vadd.f32 %v934_v3, %v913_v61  ;;  %975 = vst [vmem:[%s1678_s29 + $0x10] sm:$0xff] %v967_v39 }
 0x22a   : > { %v946_v8 = vadd.f32 %v934_v3, %v914_v62  ;;  %v915_v11 = vld [vmem:[#allocation2 + $0x30] sm:$0xff]  ;;  %976 = vst [vmem:[%s1678_s29 + $0x18] sm:$0xff] %v968_v40 }
 0x22b   : > { %v961_v12 = vadd.f32 %v953_v1, %v945_v7  ;;  %v916_v16 = vld [vmem:[#allocation2 + $0x38] sm:$0xff]  ;;  %v947_v29 = vadd.f32 %v939_v21, %v915_v11 }
 0x22c   : > { %v962_v13 = vadd.f32 %v954_v2, %v946_v8  ;;  %v948_v30 = vadd.f32 %v939_v21, %v916_v16 }
 0x22d   : > { %v969_v23 = vmax.f32 %v961_v12, 0.0  ;;  %v963_v33 = vadd.f32 %v955_v19, %v947_v29 }
 0x22e   : > { %v970_v24 = vmax.f32 %v962_v13, 0.0  ;;  %v964_v34 = vadd.f32 %v956_v20, %v948_v30 }
 0x22f   : > { %977 = vst [vmem:[%s1678_s29 + $0x20] sm:$0xff] %v969_v23  ;;  %v971_v37 = vmax.f32 %v963_v33, 0.0 }
 0x230   : > { %978 = vst [vmem:[%s1678_s29 + $0x28] sm:$0xff] %v970_v24  ;;  %v972_v38 = vmax.f32 %v964_v34, 0.0 }
 0x231   : > { %979 = vst [vmem:[%s1678_s29 + $0x30] sm:$0xff] %v971_v37 }
 0x232   : > { %980 = vst [vmem:[%s1678_s29 + $0x38] sm:$0xff] %v972_v38 }
 0x233 PF: > { %987 = sbr.rel (!%p1574_p13) target bundleno = 571 (0x23b), region = 151  ;;  %s1199_s30 = sshll.u32 (%p1574_p13), %s1423_s25, 4  ;;  %v1003_v41 = vld [vmem:[%s1678_s29] sm:$0xff] (%p1574_p13)  ;;  %v1005_v42 = vld [vmem:[%s1678_s29 + $0x8] sm:$0xff] (%p1574_p13)  ;;  %v1007_v43 = vld [vmem:[%s1678_s29 + $0x10] sm:$0xff] (%p1574_p13) }
 0x234   : > { %s990_s14 = scalar_lea.vmem (%p1574_p13), %s1802_s5, %s1199_s30  ;;  %v1009_v44 = vld [vmem:[%s1678_s29 + $0x18] sm:$0xff] (%p1574_p13) }
 0x235   : > { %1004 = vst [vmem:[%s990_s14] sm:$0xff] (%p1574_p13), %v1003_v41  ;;  %1006 = vst [vmem:[%s990_s14 + $0x8] sm:$0xff] (%p1574_p13), %v1005_v42 }
 0x236   : > { %v1011_v45 = vld [vmem:[%s1678_s29 + $0x20] sm:$0xff] (%p1574_p13)  ;;  %1008 = vst [vmem:[%s990_s14 + $0x20] sm:$0xff] (%p1574_p13), %v1007_v43  ;;  %1010 = vst [vmem:[%s990_s14 + $0x28] sm:$0xff] (%p1574_p13), %v1009_v44 }
 0x237   : > { %v1013_v46 = vld [vmem:[%s1678_s29 + $0x28] sm:$0xff] (%p1574_p13)  ;;  %1012 = vst [vmem:[%s990_s14 + $0x40] sm:$0xff] (%p1574_p13), %v1011_v45 }
 0x238   : > { %1014 = vst [vmem:[%s990_s14 + $0x48] sm:$0xff] (%p1574_p13), %v1013_v46  ;;  %v1015_v47 = vld [vmem:[%s1678_s29 + $0x30] sm:$0xff] (%p1574_p13) }
 0x239   : > { %v1017_v48 = vld [vmem:[%s1678_s29 + $0x38] sm:$0xff] (%p1574_p13)  ;;  %1016 = vst [vmem:[%s990_s14 + $0x60] sm:$0xff] (%p1574_p13), %v1015_v47 }
 0x23a   : > { %1018 = vst [vmem:[%s990_s14 + $0x68] sm:$0xff] %v1017_v48 }
 0x23b PF: > { %s15_s28 = sadd.s32 1, %s1435_s28   ;;  %s1816_s22 = sld [smem:[#allocation7_spill]] }
 0x23c   : > { %p12_p6 = scmp.ge.s32.totalorder %s15_s28, 6   ;;  %s1817_s23 = sld [smem:[#allocation10_spill]] }
 0x23d   : > { %s1818_s8 = sld [smem:[#allocation8_spill]]  ;;  %s1819_s9 = sld [smem:[#allocation9_spill]] }
 0x23e   : > { %s1820_s18 = smov %s1399_s19  ;;  %s1821_s19 = smov %s1566_s17 }
 0x23f   : > { %s1822_s20 = smov %s1407_s21  ;;  %s1823_s21 = smov %s1563_s16 }
 0x240   : > { %s1824_s24 = smov %s1427_s26  ;;  %s1825_s25 = smov %s1431_s27 }
 0x241   :  { %14 = sbr.rel (!%p12_p6) target bundleno = 8 (0x8), region = 221 }
 0x243   : > { %s1826_s26 = smov %s1818_s8  ;;  %s1827_s27 = smov %s1819_s9 }

</bundles_post_ra>
